<compile_context>
chip_gen: v7x
topology: tpu7x:2x2x1
jax: 0.10.0
libtpu: 0.0.40
codegen_flags: <defaults>
</compile_context>

<pallas_src>
import numpy as np
import jax
import jax.numpy as jnp
from jax.experimental import pallas as pl
from jax.experimental.pallas import tpu as pltpu


IN_C, IN_H, IN_W = 3, 16, 16
INPLANES = 8
NUM_CLASSES = 1          # classifier+bilinear folding below assumes 1 class
_BN_EPS = 1e-5


# ----------------------------- the Pallas kernel -----------------------------

def _resnet_fused_kernel(x_ref, ts_ref, bs_ref,
                         t1_ref, b1_ref, t2_ref, b2_ref,
                         t3_ref, b3_ref, t45_ref, b45_ref,
                         tcls_ref, bcls_ref, o_ref):
    """Entire ResNetUpSample forward; all activations stay resident in VMEM/vregs."""

    def dot(a, t_ref, b_ref):
        # MXU dot with bf16 inputs / f32 accumulation; bias epilogue stays f32
        # (v5e-safe: no bf16 VPU work).
        return jnp.dot(a.astype(jnp.bfloat16), t_ref[...],
                       preferred_element_type=jnp.float32) + b_ref[...]

    # ---- stem: conv7x7/s2 + BN + ReLU as ONE Toeplitz matmul ----------------
    # Output columns are ordered (h%2, h//2, w%2, w//2, c):
    #   col = hp*256 + hh*64 + wp*32 + wh*8 + c,   h = 2*hh+hp,  w = 2*wh+wp
    s = jnp.maximum(dot(x_ref[...], ts_ref, bs_ref), 0.0)          # [N, 512]

    # ---- 3x3/s2/p1 ceil-mode max-pool (8x8 -> 5x5), fully in-register -------
    # Separable: pool h first, then w.  Window for output j covers inputs
    # {2j-1, 2j, 2j+1} clipped to range, so with even/odd halves E/O and
    # B = max(E, O):  out[0]=B[0], out[1..3]=max(B[1..3], O[0..2]), out[4]=O[3].
    # All slices below are contiguous lane slices (exact clipped windows;
    # no pad value is ever consumed).
    even_h = s[:, 0:256]                                            # h = 0,2,4,6
    odd_h = s[:, 256:512]                                           # h = 1,3,5,7
    bh = jnp.maximum(even_h, odd_h)
    hpool = jnp.concatenate(
        [bh[:, 0:64],                                               # oh = 0
         jnp.maximum(bh[:, 64:256], odd_h[:, 0:192]),               # oh = 1..3
         odd_h[:, 192:256]],                                        # oh = 4
        axis=1)                                                     # [N, 320]
    # each 64-lane block j is one oh row, inner order (w%2, w//2, c)
    pieces = []
    for j in range(5):
        blk = hpool[:, 64 * j:64 * j + 64]
        even_w, odd_w = blk[:, 0:32], blk[:, 32:64]
        bw = jnp.maximum(even_w, odd_w)
        pieces += [bw[:, 0:8],                                      # ow = 0
                   jnp.maximum(bw[:, 8:32], odd_w[:, 0:24]),        # ow = 1..3
                   odd_w[:, 24:32]]                                 # ow = 4
    pooled = jnp.concatenate(pieces, axis=1)                        # [N, 200] (h,w,c)

    # ---- layer1: BasicBlock(8 -> 8, stride 1, identity residual) ------------
    h1 = jnp.maximum(dot(pooled, t1_ref, b1_ref), 0.0)
    l1 = jnp.maximum(dot(h1, t2_ref, b2_ref) + pooled, 0.0)         # [N, 200]

    # ---- layer2: BasicBlock(8 -> 16, stride 2, 1x1/s2 downsample) -----------
    # conv2 and the downsample conv are fused into a single dot: [h2 | l1] @ [T4; T5]
    h2 = jnp.maximum(dot(l1, t3_ref, b3_ref), 0.0)                  # [N, 144]
    l2 = jnp.maximum(dot(jnp.concatenate([h2, l1], axis=1),
                         t45_ref, b45_ref), 0.0)                    # [N, 144]

    # ---- classifier 1x1 conv (+bias) folded with bilinear upsample ----------
    o_ref[...] = dot(l2, tcls_ref, bcls_ref)                        # [N, 256]


# ----------------------- init-time weight folding (numpy) --------------------

def _he_normal(key, kh, kw, cin, cout):
    # PyTorch ResNet init: normal(0, sqrt(2 / (kh*kw*cout)))
    n = kh * kw * cout
    w = np.asarray(jax.random.normal(key, (kh, kw, cin, cout), jnp.float32))
    return (w * np.sqrt(2.0 / n)).astype(np.float32)


def _bn_affine(c):
    # Eval-mode BN with fresh stats: gamma=1, beta=0, mean=0, var=1.
    gamma = np.ones(c, np.float32)
    beta = np.zeros(c, np.float32)
    mean = np.zeros(c, np.float32)
    var = np.ones(c, np.float32)
    scale = gamma / np.sqrt(var + _BN_EPS)
    shift = beta - mean * scale
    return scale, shift


def _conv_toeplitz(w, H, W, stride, padding):
    """w: [KH,KW,Cin,Cout].  Returns (T, OH, OW) with T [H*W*Cin, OH*OW*Cout]
    such that flat(y)[n] = flat(x)[n] @ T implements Conv2d (no bias),
    flattening order (h, w, c) on both sides."""
    KH, KW, Cin, Cout = w.shape
    OH = (H + 2 * padding - KH) // stride + 1
    OW = (W + 2 * padding - KW) // stride + 1
    T = np.zeros((H * W * Cin, OH * OW * Cout), np.float32)
    for oh in range(OH):
        for ow in range(OW):
            c0 = (oh * OW + ow) * Cout
            for kh in range(KH):
                ih = oh * stride + kh - padding
                if ih < 0 or ih >= H:
                    continue
                for kw in range(KW):
                    iw = ow * stride + kw - padding
                    if iw < 0 or iw >= W:
                        continue
                    r0 = (ih * W + iw) * Cin
                    T[r0:r0 + Cin, c0:c0 + Cout] = w[kh, kw]
    return T, OH, OW


def _pool_out(d, k=3, s=2, p=1):
    # PyTorch MaxPool2d ceil_mode output size.
    o = -(-(d + 2 * p - k) // s) + 1
    if (o - 1) * s >= d + p:
        o -= 1
    return o


def _bilinear_matrix(out_size, in_size):
    """Bilinear resize matrix, align_corners=False (F.interpolate default)."""
    if in_size == 1:
        return np.ones((out_size, 1), np.float32)
    i = np.arange(out_size, dtype=np.float64)
    src = (i + 0.5) * in_size / out_size - 0.5
    src = np.clip(src, 0.0, in_size - 1)
    i0 = np.floor(src).astype(np.int64)
    i1 = np.minimum(i0 + 1, in_size - 1)
    frac = (src - i0).astype(np.float32)
    M = np.zeros((out_size, in_size), np.float32)
    M[np.arange(out_size), i0] += 1.0 - frac
    M[np.arange(out_size), i1] += frac
    return M          # rows sum to 1


def init_params(key):
    ks = jax.random.split(key, 8)

    # --- stem: conv7x7/s2/p3 (3->8, no bias) + BN folded into ONE matrix ---
    w1 = _he_normal(ks[0], 7, 7, IN_C, INPLANES)
    sc, sh = _bn_affine(INPLANES)
    T_std, CH, CW = _conv_toeplitz(w1 * sc[None, None, None, :], IN_H, IN_W, 2, 3)
    b_std = np.tile(sh, CH * CW)                                 # [512]
    assert (CH, CW) == (8, 8), (CH, CW)          # in-kernel pool assumes 8x8 -> 5x5
    PH, PW = _pool_out(CH), _pool_out(CW)
    assert (PH, PW) == (5, 5), (PH, PW)

    # Row permutation: rows in NCHW-flat order so the wrapper passes
    # x.reshape(N, C*H*W) directly (no transpose outside the kernel).
    r = np.arange(IN_C * IN_H * IN_W)
    c_ = r // (IN_H * IN_W)
    h_ = (r % (IN_H * IN_W)) // IN_W
    w_ = r % IN_W
    row_idx = (h_ * IN_W + w_) * IN_C + c_

    # Column permutation: (h%2, h//2, w%2, w//2, c) grouping so the ceil-mode
    # 3x3/s2 max-pool becomes contiguous lane slices + maxima in the kernel.
    col_idx = np.empty(CH * CW * INPLANES, np.int64)
    for h in range(CH):
        for w in range(CW):
            for c in range(INPLANES):
                new = ((((h % 2) * (CH // 2) + h // 2) * 2 + (w % 2)) * (CW // 2)
                       + w // 2) * INPLANES + c
                col_idx[new] = (h * CW + w) * INPLANES + c
    T_stem = T_std[row_idx][:, col_idx]                          # [768, 512]
    b_stem = b_std[col_idx][None, :]                             # [1, 512]

    # --- layer1: BasicBlock(8 -> 8, stride 1), BN folded ---
    w = _he_normal(ks[1], 3, 3, 8, 8)
    sc, sh = _bn_affine(8)
    T1, H1, W1 = _conv_toeplitz(w * sc[None, None, None, :], PH, PW, 1, 1)
    b1 = np.tile(sh, H1 * W1)[None, :]
    w = _he_normal(ks[2], 3, 3, 8, 8)
    sc, sh = _bn_affine(8)
    T2, _, _ = _conv_toeplitz(w * sc[None, None, None, :], H1, W1, 1, 1)
    b2 = np.tile(sh, H1 * W1)[None, :]

    # --- layer2: BasicBlock(8 -> 16, stride 2, 1x1/s2 downsample), BN folded.
    #     conv2 and the downsample share one fused matrix [T4; T5]. ---
    w = _he_normal(ks[3], 3, 3, 8, 16)
    sc, sh = _bn_affine(16)
    T3, H2, W2 = _conv_toeplitz(w * sc[None, None, None, :], H1, W1, 2, 1)
    b3 = np.tile(sh, H2 * W2)[None, :]
    w = _he_normal(ks[4], 3, 3, 16, 16)
    sc, sh = _bn_affine(16)
    T4, _, _ = _conv_toeplitz(w * sc[None, None, None, :], H2, W2, 1, 1)
    b4 = np.tile(sh, H2 * W2)
    w = _he_normal(ks[5], 1, 1, 8, 16)
    sc, sh = _bn_affine(16)
    T5, _, _ = _conv_toeplitz(w * sc[None, None, None, :], H1, W1, 2, 0)
    b5 = np.tile(sh, H2 * W2)
    T45 = np.concatenate([T4, T5], axis=0)                       # [344, 144]
    b45 = (b4 + b5)[None, :]                                     # [1, 144]

    # --- classifier 1x1 conv (16 -> 1, with bias) folded with bilinear
    #     upsample (3x3 -> 16x16, align_corners=False) ---
    wc = (np.asarray(jax.random.normal(ks[6], (16,), jnp.float32)) * 0.1).astype(np.float32)
    bc = float(np.asarray(jax.random.normal(ks[7], (1,), jnp.float32))[0] * 0.1)
    B2 = np.kron(_bilinear_matrix(IN_H, H2), _bilinear_matrix(IN_W, W2))   # [256, 9]
    Tcls = np.zeros((H2 * W2 * 16, IN_H * IN_W), np.float32)
    for p in range(H2 * W2):
        Tcls[p * 16:(p + 1) * 16, :] = np.outer(wc, B2[:, p])
    bcls = np.full((1, IN_H * IN_W), bc, np.float32)      # bilinear rows sum to 1

    bf16 = lambda a: jnp.asarray(a, jnp.bfloat16)
    f32 = lambda a: jnp.asarray(a, jnp.float32)
    return dict(
        T_stem=bf16(T_stem), b_stem=f32(b_stem),
        T1=bf16(T1), b1=f32(b1), T2=bf16(T2), b2=f32(b2),
        T3=bf16(T3), b3=f32(b3), T45=bf16(T45), b45=f32(b45),
        Tcls=bf16(Tcls), bcls=f32(bcls))


# --------------------------------- forward -----------------------------------

def resnet_upsample_forward(params, x_nchw):
    N, C, H, W = x_nchw.shape
    assert (C, H, W) == (IN_C, IN_H, IN_W), (C, H, W)
    # NCHW flat order is baked into T_stem's row permutation; just flatten + cast.
    x_flat = x_nchw.reshape(N, C * H * W).astype(jnp.bfloat16)

    args = [x_flat,
            params['T_stem'], params['b_stem'],
            params['T1'], params['b1'], params['T2'], params['b2'],
            params['T3'], params['b3'], params['T45'], params['b45'],
            params['Tcls'], params['bcls']]

    vmem = pl.BlockSpec(memory_space=pltpu.MemorySpace.VMEM)
    out_flat = pl.pallas_call(
        _resnet_fused_kernel,
        in_specs=[vmem] * len(args),
        out_specs=pl.BlockSpec(memory_space=pltpu.MemorySpace.VMEM),
        out_shape=jax.ShapeDtypeStruct((N, H * W * NUM_CLASSES), jnp.float32),
    )(*args)

    # flat (oy*W + ox) per image, single class -> NCHW
    return out_flat.reshape(N, H, W, NUM_CLASSES).transpose(0, 3, 1, 2)


if __name__ == "__main__":
    key = jax.random.PRNGKey(0)
    pkey, xkey = jax.random.split(key)
    params = init_params(pkey)
    x = jax.random.normal(xkey, (2, 3, 16, 16), jnp.float32)      # NCHW input
    fwd = jax.jit(resnet_upsample_forward)
    out = fwd(params, x)
    jax.block_until_ready(out)
    assert out.shape == (2, 1, 16, 16), out.shape
    assert bool(jnp.all(jnp.isfinite(out)))
    print("KERNEL_OK")
</pallas_src>

<mosaic_0001>
module attributes {stable_mosaic.version = 11 : i64} {
  func.func @_resnet_fused_kernel(%arg0: memref<2x768xbf16, #tpu.memory_space<vmem>>, %arg1: memref<768x512xbf16, #tpu.memory_space<vmem>>, %arg2: memref<1x512xf32, #tpu.memory_space<vmem>>, %arg3: memref<200x200xbf16, #tpu.memory_space<vmem>>, %arg4: memref<1x200xf32, #tpu.memory_space<vmem>>, %arg5: memref<200x200xbf16, #tpu.memory_space<vmem>>, %arg6: memref<1x200xf32, #tpu.memory_space<vmem>>, %arg7: memref<200x144xbf16, #tpu.memory_space<vmem>>, %arg8: memref<1x144xf32, #tpu.memory_space<vmem>>, %arg9: memref<344x144xbf16, #tpu.memory_space<vmem>>, %arg10: memref<1x144xf32, #tpu.memory_space<vmem>>, %arg11: memref<144x256xbf16, #tpu.memory_space<vmem>>, %arg12: memref<1x256xf32, #tpu.memory_space<vmem>>, %arg13: memref<2x256xf32, #tpu.memory_space<vmem>>) attributes {dimension_semantics = [], scalar_prefetch = 0 : i64, scratch_operands = 0 : i64, tpu.core_type = #tpu.core_type<tc>} {
    %c0 = arith.constant 0 : index
    %c0_0 = arith.constant 0 : index
    %0 = vector.load %arg0[%c0, %c0_0] : memref<2x768xbf16, #tpu.memory_space<vmem>>, vector<2x768xbf16>
    %c0_1 = arith.constant 0 : index
    %c0_2 = arith.constant 0 : index
    %1 = vector.load %arg1[%c0_1, %c0_2] : memref<768x512xbf16, #tpu.memory_space<vmem>>, vector<768x512xbf16>
    %cst = arith.constant dense<0.000000e+00> : vector<2x512xf32>
    %2 = tpu.matmul %0, %1, %cst {dimension_numbers = #tpu.dot_dimension_numbers<[1], [0], [0], [1], [0, 0, 1, 1], [], []>} : vector<2x768xbf16>, vector<768x512xbf16>, vector<2x512xf32> -> vector<2x512xf32>
    %c0_3 = arith.constant 0 : index
    %c0_4 = arith.constant 0 : index
    %3 = vector.load %arg2[%c0_3, %c0_4] : memref<1x512xf32, #tpu.memory_space<vmem>>, vector<1x512xf32>
    %4 = vector.broadcast %3 : vector<1x512xf32> to vector<2x512xf32>
    %5 = arith.addf %2, %4 : vector<2x512xf32>
    %cst_5 = arith.constant 0.000000e+00 : f32
    %6 = vector.broadcast %cst_5 : f32 to vector<2x512xf32>
    %7 = arith.maximumf %5, %6 : vector<2x512xf32>
    %8 = vector.extract_strided_slice %7 {offsets = [0, 0], sizes = [2, 256], strides = [1, 1]} : vector<2x512xf32> to vector<2x256xf32>
    %9 = vector.extract_strided_slice %7 {offsets = [0, 256], sizes = [2, 256], strides = [1, 1]} : vector<2x512xf32> to vector<2x256xf32>
    %10 = arith.maximumf %8, %9 : vector<2x256xf32>
    %11 = vector.extract_strided_slice %10 {offsets = [0, 0], sizes = [2, 64], strides = [1, 1]} : vector<2x256xf32> to vector<2x64xf32>
    %12 = vector.extract_strided_slice %10 {offsets = [0, 64], sizes = [2, 192], strides = [1, 1]} : vector<2x256xf32> to vector<2x192xf32>
    %13 = vector.extract_strided_slice %9 {offsets = [0, 0], sizes = [2, 192], strides = [1, 1]} : vector<2x256xf32> to vector<2x192xf32>
    %14 = arith.maximumf %12, %13 : vector<2x192xf32>
    %15 = vector.extract_strided_slice %9 {offsets = [0, 192], sizes = [2, 64], strides = [1, 1]} : vector<2x256xf32> to vector<2x64xf32>
    %16 = tpu.concatenate %11, %14, %15 in 1 : vector<2x64xf32>, vector<2x192xf32>, vector<2x64xf32> -> vector<2x320xf32>
    %17 = vector.extract_strided_slice %16 {offsets = [0, 0], sizes = [2, 64], strides = [1, 1]} : vector<2x320xf32> to vector<2x64xf32>
    %18 = vector.extract_strided_slice %17 {offsets = [0, 0], sizes = [2, 32], strides = [1, 1]} : vector<2x64xf32> to vector<2x32xf32>
    %19 = vector.extract_strided_slice %17 {offsets = [0, 32], sizes = [2, 32], strides = [1, 1]} : vector<2x64xf32> to vector<2x32xf32>
    %20 = arith.maximumf %18, %19 : vector<2x32xf32>
    %21 = vector.extract_strided_slice %20 {offsets = [0, 0], sizes = [2, 8], strides = [1, 1]} : vector<2x32xf32> to vector<2x8xf32>
    %22 = vector.extract_strided_slice %20 {offsets = [0, 8], sizes = [2, 24], strides = [1, 1]} : vector<2x32xf32> to vector<2x24xf32>
    %23 = vector.extract_strided_slice %19 {offsets = [0, 0], sizes = [2, 24], strides = [1, 1]} : vector<2x32xf32> to vector<2x24xf32>
    %24 = arith.maximumf %22, %23 : vector<2x24xf32>
    %25 = vector.extract_strided_slice %19 {offsets = [0, 24], sizes = [2, 8], strides = [1, 1]} : vector<2x32xf32> to vector<2x8xf32>
    %26 = vector.extract_strided_slice %16 {offsets = [0, 64], sizes = [2, 64], strides = [1, 1]} : vector<2x320xf32> to vector<2x64xf32>
    %27 = vector.extract_strided_slice %26 {offsets = [0, 0], sizes = [2, 32], strides = [1, 1]} : vector<2x64xf32> to vector<2x32xf32>
    %28 = vector.extract_strided_slice %26 {offsets = [0, 32], sizes = [2, 32], strides = [1, 1]} : vector<2x64xf32> to vector<2x32xf32>
    %29 = arith.maximumf %27, %28 : vector<2x32xf32>
    %30 = vector.extract_strided_slice %29 {offsets = [0, 0], sizes = [2, 8], strides = [1, 1]} : vector<2x32xf32> to vector<2x8xf32>
    %31 = vector.extract_strided_slice %29 {offsets = [0, 8], sizes = [2, 24], strides = [1, 1]} : vector<2x32xf32> to vector<2x24xf32>
    %32 = vector.extract_strided_slice %28 {offsets = [0, 0], sizes = [2, 24], strides = [1, 1]} : vector<2x32xf32> to vector<2x24xf32>
    %33 = arith.maximumf %31, %32 : vector<2x24xf32>
    %34 = vector.extract_strided_slice %28 {offsets = [0, 24], sizes = [2, 8], strides = [1, 1]} : vector<2x32xf32> to vector<2x8xf32>
    %35 = vector.extract_strided_slice %16 {offsets = [0, 128], sizes = [2, 64], strides = [1, 1]} : vector<2x320xf32> to vector<2x64xf32>
    %36 = vector.extract_strided_slice %35 {offsets = [0, 0], sizes = [2, 32], strides = [1, 1]} : vector<2x64xf32> to vector<2x32xf32>
    %37 = vector.extract_strided_slice %35 {offsets = [0, 32], sizes = [2, 32], strides = [1, 1]} : vector<2x64xf32> to vector<2x32xf32>
    %38 = arith.maximumf %36, %37 : vector<2x32xf32>
    %39 = vector.extract_strided_slice %38 {offsets = [0, 0], sizes = [2, 8], strides = [1, 1]} : vector<2x32xf32> to vector<2x8xf32>
    %40 = vector.extract_strided_slice %38 {offsets = [0, 8], sizes = [2, 24], strides = [1, 1]} : vector<2x32xf32> to vector<2x24xf32>
    %41 = vector.extract_strided_slice %37 {offsets = [0, 0], sizes = [2, 24], strides = [1, 1]} : vector<2x32xf32> to vector<2x24xf32>
    %42 = arith.maximumf %40, %41 : vector<2x24xf32>
    %43 = vector.extract_strided_slice %37 {offsets = [0, 24], sizes = [2, 8], strides = [1, 1]} : vector<2x32xf32> to vector<2x8xf32>
    %44 = vector.extract_strided_slice %16 {offsets = [0, 192], sizes = [2, 64], strides = [1, 1]} : vector<2x320xf32> to vector<2x64xf32>
    %45 = vector.extract_strided_slice %44 {offsets = [0, 0], sizes = [2, 32], strides = [1, 1]} : vector<2x64xf32> to vector<2x32xf32>
    %46 = vector.extract_strided_slice %44 {offsets = [0, 32], sizes = [2, 32], strides = [1, 1]} : vector<2x64xf32> to vector<2x32xf32>
    %47 = arith.maximumf %45, %46 : vector<2x32xf32>
    %48 = vector.extract_strided_slice %47 {offsets = [0, 0], sizes = [2, 8], strides = [1, 1]} : vector<2x32xf32> to vector<2x8xf32>
    %49 = vector.extract_strided_slice %47 {offsets = [0, 8], sizes = [2, 24], strides = [1, 1]} : vector<2x32xf32> to vector<2x24xf32>
    %50 = vector.extract_strided_slice %46 {offsets = [0, 0], sizes = [2, 24], strides = [1, 1]} : vector<2x32xf32> to vector<2x24xf32>
    %51 = arith.maximumf %49, %50 : vector<2x24xf32>
    %52 = vector.extract_strided_slice %46 {offsets = [0, 24], sizes = [2, 8], strides = [1, 1]} : vector<2x32xf32> to vector<2x8xf32>
    %53 = vector.extract_strided_slice %16 {offsets = [0, 256], sizes = [2, 64], strides = [1, 1]} : vector<2x320xf32> to vector<2x64xf32>
    %54 = vector.extract_strided_slice %53 {offsets = [0, 0], sizes = [2, 32], strides = [1, 1]} : vector<2x64xf32> to vector<2x32xf32>
    %55 = vector.extract_strided_slice %53 {offsets = [0, 32], sizes = [2, 32], strides = [1, 1]} : vector<2x64xf32> to vector<2x32xf32>
    %56 = arith.maximumf %54, %55 : vector<2x32xf32>
    %57 = vector.extract_strided_slice %56 {offsets = [0, 0], sizes = [2, 8], strides = [1, 1]} : vector<2x32xf32> to vector<2x8xf32>
    %58 = vector.extract_strided_slice %56 {offsets = [0, 8], sizes = [2, 24], strides = [1, 1]} : vector<2x32xf32> to vector<2x24xf32>
    %59 = vector.extract_strided_slice %55 {offsets = [0, 0], sizes = [2, 24], strides = [1, 1]} : vector<2x32xf32> to vector<2x24xf32>
    %60 = arith.maximumf %58, %59 : vector<2x24xf32>
    %61 = vector.extract_strided_slice %55 {offsets = [0, 24], sizes = [2, 8], strides = [1, 1]} : vector<2x32xf32> to vector<2x8xf32>
    %62 = tpu.concatenate %21, %24, %25, %30, %33, %34, %39, %42, %43, %48, %51, %52, %57, %60, %61 in 1 : vector<2x8xf32>, vector<2x24xf32>, vector<2x8xf32>, vector<2x8xf32>, vector<2x24xf32>, vector<2x8xf32>, vector<2x8xf32>, vector<2x24xf32>, vector<2x8xf32>, vector<2x8xf32>, vector<2x24xf32>, vector<2x8xf32>, vector<2x8xf32>, vector<2x24xf32>, vector<2x8xf32> -> vector<2x200xf32>
    %63 = arith.truncf %62 : vector<2x200xf32> to vector<2x200xbf16>
    %c0_6 = arith.constant 0 : index
    %c0_7 = arith.constant 0 : index
    %64 = vector.load %arg3[%c0_6, %c0_7] : memref<200x200xbf16, #tpu.memory_space<vmem>>, vector<200x200xbf16>
    %cst_8 = arith.constant dense<0.000000e+00> : vector<2x200xf32>
    %65 = tpu.matmul %63, %64, %cst_8 {dimension_numbers = #tpu.dot_dimension_numbers<[1], [0], [0], [1], [0, 0, 1, 1], [], []>} : vector<2x200xbf16>, vector<200x200xbf16>, vector<2x200xf32> -> vector<2x200xf32>
    %c0_9 = arith.constant 0 : index
    %c0_10 = arith.constant 0 : index
    %66 = vector.load %arg4[%c0_9, %c0_10] : memref<1x200xf32, #tpu.memory_space<vmem>>, vector<1x200xf32>
    %67 = vector.broadcast %66 : vector<1x200xf32> to vector<2x200xf32>
    %68 = arith.addf %65, %67 : vector<2x200xf32>
    %cst_11 = arith.constant 0.000000e+00 : f32
    %69 = vector.broadcast %cst_11 : f32 to vector<2x200xf32>
    %70 = arith.maximumf %68, %69 : vector<2x200xf32>
    %71 = arith.truncf %70 : vector<2x200xf32> to vector<2x200xbf16>
    %c0_12 = arith.constant 0 : index
    %c0_13 = arith.constant 0 : index
    %72 = vector.load %arg5[%c0_12, %c0_13] : memref<200x200xbf16, #tpu.memory_space<vmem>>, vector<200x200xbf16>
    %cst_14 = arith.constant dense<0.000000e+00> : vector<2x200xf32>
    %73 = tpu.matmul %71, %72, %cst_14 {dimension_numbers = #tpu.dot_dimension_numbers<[1], [0], [0], [1], [0, 0, 1, 1], [], []>} : vector<2x200xbf16>, vector<200x200xbf16>, vector<2x200xf32> -> vector<2x200xf32>
    %c0_15 = arith.constant 0 : index
    %c0_16 = arith.constant 0 : index
    %74 = vector.load %arg6[%c0_15, %c0_16] : memref<1x200xf32, #tpu.memory_space<vmem>>, vector<1x200xf32>
    %75 = vector.broadcast %74 : vector<1x200xf32> to vector<2x200xf32>
    %76 = arith.addf %73, %75 : vector<2x200xf32>
    %77 = arith.addf %76, %62 : vector<2x200xf32>
    %cst_17 = arith.constant 0.000000e+00 : f32
    %78 = vector.broadcast %cst_17 : f32 to vector<2x200xf32>
    %79 = arith.maximumf %77, %78 : vector<2x200xf32>
    %80 = arith.truncf %79 : vector<2x200xf32> to vector<2x200xbf16>
    %c0_18 = arith.constant 0 : index
    %c0_19 = arith.constant 0 : index
    %81 = vector.load %arg7[%c0_18, %c0_19] : memref<200x144xbf16, #tpu.memory_space<vmem>>, vector<200x144xbf16>
    %cst_20 = arith.constant dense<0.000000e+00> : vector<2x144xf32>
    %82 = tpu.matmul %80, %81, %cst_20 {dimension_numbers = #tpu.dot_dimension_numbers<[1], [0], [0], [1], [0, 0, 1, 1], [], []>} : vector<2x200xbf16>, vector<200x144xbf16>, vector<2x144xf32> -> vector<2x144xf32>
    %c0_21 = arith.constant 0 : index
    %c0_22 = arith.constant 0 : index
    %83 = vector.load %arg8[%c0_21, %c0_22] : memref<1x144xf32, #tpu.memory_space<vmem>>, vector<1x144xf32>
    %84 = vector.broadcast %83 : vector<1x144xf32> to vector<2x144xf32>
    %85 = arith.addf %82, %84 : vector<2x144xf32>
    %cst_23 = arith.constant 0.000000e+00 : f32
    %86 = vector.broadcast %cst_23 : f32 to vector<2x144xf32>
    %87 = arith.maximumf %85, %86 : vector<2x144xf32>
    %88 = tpu.concatenate %87, %79 in 1 : vector<2x144xf32>, vector<2x200xf32> -> vector<2x344xf32>
    %89 = arith.truncf %88 : vector<2x344xf32> to vector<2x344xbf16>
    %c0_24 = arith.constant 0 : index
    %c0_25 = arith.constant 0 : index
    %90 = vector.load %arg9[%c0_24, %c0_25] : memref<344x144xbf16, #tpu.memory_space<vmem>>, vector<344x144xbf16>
    %cst_26 = arith.constant dense<0.000000e+00> : vector<2x144xf32>
    %91 = tpu.matmul %89, %90, %cst_26 {dimension_numbers = #tpu.dot_dimension_numbers<[1], [0], [0], [1], [0, 0, 1, 1], [], []>} : vector<2x344xbf16>, vector<344x144xbf16>, vector<2x144xf32> -> vector<2x144xf32>
    %c0_27 = arith.constant 0 : index
    %c0_28 = arith.constant 0 : index
    %92 = vector.load %arg10[%c0_27, %c0_28] : memref<1x144xf32, #tpu.memory_space<vmem>>, vector<1x144xf32>
    %93 = vector.broadcast %92 : vector<1x144xf32> to vector<2x144xf32>
    %94 = arith.addf %91, %93 : vector<2x144xf32>
    %cst_29 = arith.constant 0.000000e+00 : f32
    %95 = vector.broadcast %cst_29 : f32 to vector<2x144xf32>
    %96 = arith.maximumf %94, %95 : vector<2x144xf32>
    %97 = arith.truncf %96 : vector<2x144xf32> to vector<2x144xbf16>
    %c0_30 = arith.constant 0 : index
    %c0_31 = arith.constant 0 : index
    %98 = vector.load %arg11[%c0_30, %c0_31] : memref<144x256xbf16, #tpu.memory_space<vmem>>, vector<144x256xbf16>
    %cst_32 = arith.constant dense<0.000000e+00> : vector<2x256xf32>
    %99 = tpu.matmul %97, %98, %cst_32 {dimension_numbers = #tpu.dot_dimension_numbers<[1], [0], [0], [1], [0, 0, 1, 1], [], []>} : vector<2x144xbf16>, vector<144x256xbf16>, vector<2x256xf32> -> vector<2x256xf32>
    %c0_33 = arith.constant 0 : index
    %c0_34 = arith.constant 0 : index
    %100 = vector.load %arg12[%c0_33, %c0_34] : memref<1x256xf32, #tpu.memory_space<vmem>>, vector<1x256xf32>
    %101 = vector.broadcast %100 : vector<1x256xf32> to vector<2x256xf32>
    %102 = arith.addf %99, %101 : vector<2x256xf32>
    %c0_35 = arith.constant 0 : index
    %c0_36 = arith.constant 0 : index
    %103 = vector.load %arg13[%c0_35, %c0_36] : memref<2x256xf32, #tpu.memory_space<vmem>>, vector<2x256xf32>
    tpu.vector_store %arg13[%c0_35, %c0_36], %102 {strides = array<i32>} : memref<2x256xf32, #tpu.memory_space<vmem>>, vector<2x256xf32>,
    return
  }
}

</mosaic_0001>

<bundles_post_ra>
// kernel: resnet_upsample_forward.1
= control target key start
LH: loop header
LB: loop body
LE: loop exit
PB: predicated region body
PF: predicated region fallthrough
CT: control target
= control target key end

     0   :  { %18 = vsyncpa [#allocation3], 0  ;;  %s3755_s25 = smov [#allocation2]   ;;  %s4384_s0 = inlined_call_operand.vmem [shape: bf16[2,768], index: 0, kind: input, shape index: {}]   ;;  %s4385_s1 = inlined_call_operand.hbm [shape: bf16[768,512], index: 1, kind: input, shape index: {}]   ;;  %s4386_s2 = inlined_call_operand.vmem [shape: f32[1,512], index: 2, kind: input, shape index: {}]   ;;  %s4387_s3 = inlined_call_operand.vmem [shape: bf16[200,200], index: 3, kind: input, shape index: {}]   ;;  %s4388_s4 = inlined_call_operand.vmem [shape: f32[1,200], index: 4, kind: input, shape index: {}]   ;;  %s4389_s5 = inlined_call_operand.vmem [shape: bf16[200,200], index: 5, kind: input, shape index: {}]   ;;  %s4390_s6 = inlined_call_operand.vmem [shape: f32[1,200], index: 6, kind: input, shape index: {}]   ;;  %s4391_s7 = inlined_call_operand.vmem [shape: bf16[200,144], index: 7, kind: input, shape index: {}]   ;;  %s4392_s8 = inlined_call_operand.vmem [shape: f32[1,144], index: 8, kind: input, shape index: {}]   ;;  %s4393_s9 = inlined_call_operand.vmem [shape: bf16[344,144], index: 9, kind: input, shape index: {}]   ;;  %s4394_s10 = inlined_call_operand.vmem [shape: f32[1,144], index: 10, kind: input, shape index: {}]   ;;  %s4395_s11 = inlined_call_operand.vmem [shape: bf16[144,256], index: 11, kind: input, shape index: {}]   ;;  %s4396_s12 = inlined_call_operand.vmem [shape: f32[1,256], index: 12, kind: input, shape index: {}]   ;;  %s4397_s13 = inlined_call_operand.vmem [shape: f32[2,256], index: 13, kind: output, shape index: {}]  }
   0x1   :  { %s26_s26 = sshll.u32 %s3755_s25, 4  ;;  %s3731_s29 = scalar_lea.hbm %s4385_s1, 24576  ;;  %s27_s26 = int_to_ptr.vmem [resolvable:$true] %s26_s26 }
   0x2   :  { %p3732_p0 = scmp.ne.s32.totalorder %s4385_s1, %s3731_s29  ;;  %p3735_p1 = scmp.lt.u32.totalorder %s3731_s29, %s4385_s1 }
   0x4   :  { %p3737_p2 = pnand %p3735_p1, %p3732_p0 }
   0x6   :  { %3740 = shalt.err (!%p3737_p2)
}
   0x7   :  { %s3741_s17 = scalar_lea.vmem %s27_s26, 24576  ;;  %p3746_p4 = scmp.lt.s32.totalorder %s27_s26, %s27_s26 }
   0x8   :  { %p3742_p3 = scmp.ne.s32.totalorder %s27_s26, %s3741_s17  ;;  %p3747_p5 = scmp.lt.s32.totalorder %s3741_s17, %s3741_s17 }
   0xa   :  { %p3748_p6 = por %p3747_p5, %p3746_p4 }
   0xc   :  { %p3749_p7 = pnand %p3748_p6, %p3742_p3 }
   0xe   :  { %3752 = shalt.err (!%p3749_p7)
}
   0xf   :  { %s3756_s18 = smov 256   ;;  %s3757_s19 = smov 16  }
  0x10   :  { %32 = dma.hbm_to_vmem [thread:$0]  %s4385_s1, 24576, %s27_s26, [#allocation3], %s3756_s18, %s3756_s18, %s3757_s19  }
  0x11   :  { %3753 = dma.done.wait [#allocation3], 24576  }
  0x12   :  { %3754 = vsyncadd [#allocation3], 4294942720  ;;  %v3236_v0 = vld [vmem:[#allocation2 + $0x4] ss:$16 sps:$4 sm:$0xff]   ;;  %v3238_v1 = vld [vmem:[#allocation2 + $0xc] ss:$16 sps:$4 sm:$0xff]   ;;  %v254_v36 = vlaneseq }
  0x13   :  { %1288 = vmatprep.subr.bf16.mxu0 %v3236_v0  ;;  %v3240_v2 = vld [vmem:[#allocation2] ss:$16 sps:$4 sm:$0xff]   ;;  %v3241_v3 = vld [vmem:[#allocation2 + $0x8] ss:$16 sps:$4 sm:$0xff]   ;;  %1411 = vmatprep.subr.bf16.mxu1 %v3238_v1  ;;  %v3242_v4 = vld [vmem:[#allocation2 + $0x24] ss:$16 sps:$4 sm:$0xff]  }
  0x14   :  { %1289 = vmatpush1.bf16.msra.mxu0 %v3240_v2  ;;  %1412 = vmatpush1.bf16.msra.mxu1 %v3241_v3  ;;  %v3244_v5 = vld [vmem:[#allocation2 + $0x2c] ss:$16 sps:$4 sm:$0xff]   ;;  %v3246_v6 = vld [vmem:[#allocation2 + $0x20] ss:$16 sps:$4 sm:$0xff]   ;;  %v3247_v7 = vld [vmem:[#allocation2 + $0x28] ss:$16 sps:$4 sm:$0xff]  }
  0x15   :  { %1290 = vmatprep.subr.bf16.mxu0 %v3242_v4  ;;  %1413 = vmatprep.subr.bf16.mxu1 %v3244_v5  ;;  %v3248_v8 = vld [vmem:[#allocation2 + $0x44] ss:$16 sps:$4 sm:$0xff]   ;;  %v3250_v9 = vld [vmem:[#allocation2 + $0x4c] ss:$16 sps:$4 sm:$0xff]   ;;  %v3252_v10 = vld [vmem:[#allocation2 + $0x40] ss:$16 sps:$4 sm:$0xff]  }
  0x16   :  { %v3253_v11 = vld [vmem:[#allocation2 + $0x48] ss:$16 sps:$4 sm:$0xff]   ;;  %v3254_v12 = vld [vmem:[#allocation2 + $0x64] ss:$16 sps:$4 sm:$0xff]   ;;  %v3256_v13 = vld [vmem:[#allocation2 + $0x6c] ss:$16 sps:$4 sm:$0xff]  }
  0x17   :  { %v3258_v14 = vld [vmem:[#allocation2 + $0x60] ss:$16 sps:$4 sm:$0xff]   ;;  %v3259_v15 = vld [vmem:[#allocation2 + $0x68] ss:$16 sps:$4 sm:$0xff]   ;;  %v3260_v16 = vld [vmem:[#allocation2 + $0x84] ss:$16 sps:$4 sm:$0xff]  }
  0x18   :  { %1291 = vmatpush1.bf16.msra.mxu0 %v3246_v6  ;;  %1414 = vmatpush1.bf16.msra.mxu1 %v3247_v7  ;;  %v3262_v17 = vld [vmem:[#allocation2 + $0x8c] ss:$16 sps:$4 sm:$0xff]   ;;  %v3264_v18 = vld [vmem:[#allocation2 + $0x80] ss:$16 sps:$4 sm:$0xff]   ;;  %v3265_v19 = vld [vmem:[#allocation2 + $0x88] ss:$16 sps:$4 sm:$0xff]  }
  0x19   :  { %1292 = vmatprep.subr.bf16.mxu0 %v3248_v8  ;;  %1415 = vmatprep.subr.bf16.mxu1 %v3250_v9  ;;  %v3266_v20 = vld [vmem:[#allocation2 + $0xa4] ss:$16 sps:$4 sm:$0xff]   ;;  %v3268_v21 = vld [vmem:[#allocation2 + $0xac] ss:$16 sps:$4 sm:$0xff]   ;;  %v3270_v22 = vld [vmem:[#allocation2 + $0xa0] ss:$16 sps:$4 sm:$0xff]  }
  0x1a   :  { %v3271_v23 = vld [vmem:[#allocation2 + $0xa8] ss:$16 sps:$4 sm:$0xff]   ;;  %v3272_v24 = vld [vmem:[#allocation2 + $0xc4] ss:$16 sps:$4 sm:$0xff]   ;;  %v3274_v25 = vld [vmem:[#allocation2 + $0xcc] ss:$16 sps:$4 sm:$0xff]  }
  0x1b   :  { %v3276_v26 = vld [vmem:[#allocation2 + $0xc0] ss:$16 sps:$4 sm:$0xff]   ;;  %v3277_v27 = vld [vmem:[#allocation2 + $0xc8] ss:$16 sps:$4 sm:$0xff]   ;;  %v3278_v28 = vld [vmem:[#allocation2 + $0xe4] ss:$16 sps:$4 sm:$0xff]  }
  0x1c   :  { %1293 = vmatpush1.bf16.msra.mxu0 %v3252_v10  ;;  %1416 = vmatpush1.bf16.msra.mxu1 %v3253_v11  ;;  %v3280_v29 = vld [vmem:[#allocation2 + $0xec] ss:$16 sps:$4 sm:$0xff]   ;;  %v3282_v30 = vld [vmem:[#allocation2 + $0xe0] ss:$16 sps:$4 sm:$0xff]   ;;  %v3283_v31 = vld [vmem:[#allocation2 + $0xe8] ss:$16 sps:$4 sm:$0xff]  }
  0x1d   :  { %1294 = vmatprep.subr.bf16.mxu0 %v3254_v12  ;;  %1417 = vmatprep.subr.bf16.mxu1 %v3256_v13  ;;  %v3284_v32 = vld [vmem:[#allocation2 + $0x104] ss:$16 sps:$4 sm:$0xff]   ;;  %v3286_v33 = vld [vmem:[#allocation2 + $0x10c] ss:$16 sps:$4 sm:$0xff]   ;;  %v3288_v34 = vld [vmem:[#allocation2 + $0x100] ss:$16 sps:$4 sm:$0xff]  }
  0x1e   :  { %v3289_v35 = vld [vmem:[#allocation2 + $0x108] ss:$16 sps:$4 sm:$0xff]   ;;  %v3758_v37 = vmov 1966171168   ;;  %v3290_v39 = vld [vmem:[#allocation2 + $0x124] ss:$16 sps:$4 sm:$0xff]  }
  0x1f   :  { %v277_v38 = vunpack.c.l.s4 %v3758_v37  ;;  %v3292_v40 = vld [vmem:[#allocation2 + $0x12c] ss:$16 sps:$4 sm:$0xff]   ;;  %v3294_v41 = vld [vmem:[#allocation2 + $0x120] ss:$16 sps:$4 sm:$0xff]   ;;  %v3850_v42 = vshrl.u32 %v254_v36, 7  ;;  %vm1546_vm0 = vcmask 523264  }
  0x20   :  { %1295 = vmatpush1.bf16.msra.mxu0 %v3258_v14  ;;  %1418 = vmatpush1.bf16.msra.mxu1 %v3259_v15  ;;  %v3295_v44 = vld [vmem:[#allocation2 + $0x128] ss:$16 sps:$4 sm:$0xff]   ;;  %v3296_v45 = vld [vmem:[#allocation2 + $0x144] ss:$16 sps:$4 sm:$0xff]   ;;  %v3298_v46 = vld [vmem:[#allocation2 + $0x14c] ss:$16 sps:$4 sm:$0xff]  }
  0x21   :  { %1296 = vmatprep.subr.bf16.mxu0 %v3260_v16  ;;  %1419 = vmatprep.subr.bf16.mxu1 %v3262_v17  ;;  %v278_v43 = vunpack.c.0.s8 %v277_v38  ;;  %v3300_v47 = vld [vmem:[#allocation2 + $0x140] ss:$16 sps:$4 sm:$0xff]   ;;  %v3301_v48 = vld [vmem:[#allocation2 + $0x148] ss:$16 sps:$4 sm:$0xff]   ;;  %v3302_v50 = vld [vmem:[#allocation2 + $0x164] ss:$16 sps:$4 sm:$0xff]  }
  0x22   :  { %v3304_v51 = vld [vmem:[#allocation2 + $0x16c] ss:$16 sps:$4 sm:$0xff]   ;;  %v59_v52 = vld [vmem:[%s4384_s0] sm:$0x3f]  ;;  %v3307_v55 = vld [vmem:[#allocation2 + $0x168] ss:$16 sps:$4 sm:$0xff]  }
  0x23   :  { %v281_v49 = vsub.s32 %v278_v43, %v3850_v42  ;;  %v3306_v53 = vld [vmem:[#allocation2 + $0x160] ss:$16 sps:$4 sm:$0xff]   ;;  %v3308_v56 = vld [vmem:[#allocation2 + $0x184] ss:$16 sps:$4 sm:$0xff]   ;;  %v3310_v57 = vld [vmem:[#allocation2 + $0x18c] ss:$16 sps:$4 sm:$0xff]   ;;  %v275_v8 = vcombine.high %v59_v52, %v59_v52 }
  0x24   :  { %1297 = vmatpush1.bf16.msra.mxu0 %v3264_v18  ;;  %1420 = vmatpush1.bf16.msra.mxu1 %v3265_v19  ;;  %v3312_v59 = vld [vmem:[#allocation2 + $0x180] ss:$16 sps:$4 sm:$0xff]   ;;  %v3313_v61 = vld [vmem:[#allocation2 + $0x188] ss:$16 sps:$4 sm:$0xff]   ;;  %v3314_v62 = vld [vmem:[#allocation2 + $0x1a4] ss:$16 sps:$4 sm:$0xff]  }
  0x25   :  { %1298 = vmatprep.subr.bf16.mxu0 %v3266_v20  ;;  %1421 = vmatprep.subr.bf16.mxu1 %v3268_v21  ;;  %v282_v54 = vrot.slane %v59_v52, %v281_v49  ;;  %v3316_v63 = vld [vmem:[#allocation2 + $0x1ac] ss:$16 sps:$4 sm:$0xff]   ;;  %v3318_v0 = vld [vmem:[#allocation2 + $0x1a0] ss:$16 sps:$4 sm:$0xff]   ;;  %v3319_v1 = vld [vmem:[#allocation2 + $0x1a8] ss:$16 sps:$4 sm:$0xff]   ;;  %v289_v11 = vrot.slane %v275_v8, %v281_v49 }
  0x26   :  { %v3320_v2 = vld [vmem:[#allocation2 + $0x1c4] ss:$16 sps:$4 sm:$0xff]   ;;  %v3322_v3 = vld [vmem:[#allocation2 + $0x1cc] ss:$16 sps:$4 sm:$0xff]   ;;  %v3324_v4 = vld [vmem:[#allocation2 + $0x1c0] ss:$16 sps:$4 sm:$0xff]  }
  0x27   :  { %v290_v58 = vcombine.high %v282_v54, %v282_v54  ;;  %v3325_v5 = vld [vmem:[#allocation2 + $0x1c8] ss:$16 sps:$4 sm:$0xff]   ;;  %v3326_v6 = vld [vmem:[#allocation2 + $0x1e4] ss:$16 sps:$4 sm:$0xff]   ;;  %v3328_v7 = vld [vmem:[#allocation2 + $0x1ec] ss:$16 sps:$4 sm:$0xff]   ;;  %v291_v14 = vcombine.high %v289_v11, %v289_v11  ;;  %v3856_v16 = vrot.slane %v282_v54, %v281_v49  ;;  %v3860_v19 = vrot.slane %v289_v11, %v281_v49 }
  0x28   :  { %1299 = vmatpush1.bf16.msra.mxu0 %v3270_v22  ;;  %1422 = vmatpush1.bf16.msra.mxu1 %v3271_v23  ;;  %v3330_v9 = vld [vmem:[#allocation2 + $0x1e0] ss:$16 sps:$4 sm:$0xff]   ;;  %v3331_v10 = vld [vmem:[#allocation2 + $0x1e8] ss:$16 sps:$4 sm:$0xff]   ;;  %v3334_v12 = vld [vmem:[#allocation2 + $0x204] ss:$16 sps:$4 sm:$0xff]  }
  0x29   :  { %1300 = vmatprep.subr.bf16.mxu0 %v3272_v24  ;;  %1423 = vmatprep.subr.bf16.mxu1 %v3274_v25  ;;  %v312_v60 = vrot.slane %v290_v58, %v281_v49  ;;  %v3337_v13 = vld [vmem:[#allocation2 + $0x20c] ss:$16 sps:$4 sm:$0xff]   ;;  %v3332_v15 = vld [vmem:[#allocation2 + $0x200] ss:$16 sps:$4 sm:$0xff]   ;;  %v3335_v17 = vld [vmem:[#allocation2 + $0x208] ss:$16 sps:$4 sm:$0xff]   ;;  %v3858_v18 = vrot.slane %v291_v14, %v281_v49 }
  0x2a   :  { %v3340_v20 = vld [vmem:[#allocation2 + $0x224] ss:$16 sps:$4 sm:$0xff]   ;;  %v3343_v21 = vld [vmem:[#allocation2 + $0x22c] ss:$16 sps:$4 sm:$0xff]   ;;  %v3338_v23 = vld [vmem:[#allocation2 + $0x220] ss:$16 sps:$4 sm:$0xff]  }
  0x2b   :  { %1320 = vmatprep.mubr.bf16.mxu0 %v312_v60  ;;  %1443 = vmatprep.mubr.bf16.mxu1 %v312_v60  ;;  %v321_v22 = vcombine.high %v312_v60, %v312_v60  ;;  %v3341_v24 = vld [vmem:[#allocation2 + $0x228] ss:$16 sps:$4 sm:$0xff]   ;;  %v3346_v25 = vld [vmem:[#allocation2 + $0x244] ss:$16 sps:$4 sm:$0xff]   ;;  %v3367_v38 = vld [vmem:[#allocation2 + $0x2ac] ss:$16 sps:$4 sm:$0xff]  }
  0x2c   :  { %1301 = vmatpush1.bf16.msra.mxu0 %v3276_v26  ;;  %1424 = vmatpush1.bf16.msra.mxu1 %v3277_v27  ;;  %v3349_v26 = vld [vmem:[#allocation2 + $0x24c] ss:$16 sps:$4 sm:$0xff]   ;;  %v3344_v27 = vld [vmem:[#allocation2 + $0x240] ss:$16 sps:$4 sm:$0xff]   ;;  %v3359_v36 = vld [vmem:[#allocation2 + $0x288] ss:$16 sps:$4 sm:$0xff]  }
  0x2d   :  { %1302 = vmatprep.subr.bf16.mxu0 %v3278_v28  ;;  %1425 = vmatprep.subr.bf16.mxu1 %v3280_v29  ;;  %v3347_v28 = vld [vmem:[#allocation2 + $0x248] ss:$16 sps:$4 sm:$0xff]   ;;  %v3352_v29 = vld [vmem:[#allocation2 + $0x264] ss:$16 sps:$4 sm:$0xff]   ;;  %v3373_v43 = vld [vmem:[#allocation2 + $0x2cc] ss:$16 sps:$4 sm:$0xff]  }
  0x2e   :  { %v3364_v37 = vld [vmem:[#allocation2 + $0x2a4] ss:$16 sps:$4 sm:$0xff]   ;;  %v3377_v49 = vld [vmem:[#allocation2 + $0x2e8] ss:$16 sps:$4 sm:$0xff]   ;;  %v3380_v52 = vld [vmem:[#allocation2 + $0x300] ss:$16 sps:$4 sm:$0xff]  }
  0x2f   :  { %v3388_v54 = vld [vmem:[#allocation2 + $0x324] ss:$16 sps:$4 sm:$0xff]   ;;  %v3392_v60 = vld [vmem:[#allocation2 + $0x340] ss:$16 sps:$4 sm:$0xff]   ;;  %v3421_v11 = vld [vmem:[#allocation2 + $0x3cc] ss:$16 sps:$4 sm:$0xff]  }
  0x30   :  { %1303 = vmatpush1.bf16.msra.mxu0 %v3282_v30  ;;  %1426 = vmatpush1.bf16.msra.mxu1 %v3283_v31  ;;  %v3355_v30 = vld [vmem:[#allocation2 + $0x26c] ss:$16 sps:$4 sm:$0xff]   ;;  %v3350_v31 = vld [vmem:[#allocation2 + $0x260] ss:$16 sps:$4 sm:$0xff]   ;;  %v3394_v58 = vld [vmem:[#allocation2 + $0x344] ss:$16 sps:$4 sm:$0xff]  }
  0x31   :  { %1304 = vmatprep.subr.bf16.mxu0 %v3284_v32  ;;  %1427 = vmatprep.subr.bf16.mxu1 %v3286_v33  ;;  %v3353_v32 = vld [vmem:[#allocation2 + $0x268] ss:$16 sps:$4 sm:$0xff]   ;;  %v3358_v33 = vld [vmem:[#allocation2 + $0x284] ss:$16 sps:$4 sm:$0xff]   ;;  %v3410_v8 = vld [vmem:[#allocation2 + $0x3a0] ss:$16 sps:$4 sm:$0xff]  }
  0x32   :  { %v3424_v14 = vld [vmem:[#allocation2 + $0x3e4] ss:$16 sps:$4 sm:$0xff]   ;;  %s3760_s24 = smov 104   ;;  %s3761_s25 = smov 96   ;;  %vm1622_vm1 = vcmask 64512   ;;  %vm1624_vm2 = vcmask 261120  }
  0x33   :  { %s3762_s26 = smov 80   ;;  %s3763_s16 = smov 32   ;;  %vm1812_vm3 = vcmask 1043456   ;;  %vm1626_vm4 = vcmask 326656   ;;  %vm1628_vm5 = vcmask 392192   ;;  %vm1640_vm6 = vcmask 195584  }
  0x34   :  { %1305 = vmatpush1.bf16.msra.mxu0 %v3288_v34  ;;  %1428 = vmatpush1.bf16.msra.mxu1 %v3289_v35  ;;  %v3361_v34 = vld [vmem:[#allocation2 + $0x28c] ss:$16 sps:$4 sm:$0xff]   ;;  %v3356_v35 = vld [vmem:[#allocation2 + $0x280] ss:$16 sps:$4 sm:$0xff]   ;;  %s3764_s1 = smov 56   ;;  %vm1630_vm7 = vcmask 588800  }
  0x35   :  { %1306 = vmatprep.subr.bf16.mxu0 %v3290_v39  ;;  %1429 = vmatprep.subr.bf16.mxu1 %v3292_v40  ;;  %v3362_v39 = vld [vmem:[#allocation2 + $0x2a0] ss:$16 sps:$4 sm:$0xff]   ;;  %v3365_v40 = vld [vmem:[#allocation2 + $0x2a8] ss:$16 sps:$4 sm:$0xff]   ;;  %vm1632_vm8 = vcmask 654336   ;;  %vm1634_vm9 = vcmask 719872  }
  0x36   :  { %vm1636_vm10 = vcmask 916480   ;;  %vm1638_vm11 = vcmask 982016   ;;  %vm2302_vm12 = vcmask 130048  }
  0x38   :  { %1307 = vmatpush1.bf16.msra.mxu0 %v3294_v41  ;;  %1430 = vmatpush1.bf16.msra.mxu1 %v3295_v44  ;;  %v3370_v41 = vld [vmem:[#allocation2 + $0x2c4] ss:$16 sps:$4 sm:$0xff]   ;;  %v3368_v44 = vld [vmem:[#allocation2 + $0x2c0] ss:$16 sps:$4 sm:$0xff]  }
  0x39   :  { %1308 = vmatprep.subr.bf16.mxu0 %v3296_v45  ;;  %1431 = vmatprep.subr.bf16.mxu1 %v3298_v46  ;;  %v3371_v45 = vld [vmem:[#allocation2 + $0x2c8] ss:$16 sps:$4 sm:$0xff]   ;;  %v3376_v46 = vld [vmem:[#allocation2 + $0x2e4] ss:$16 sps:$4 sm:$0xff]  }
  0x3c   :  { %1309 = vmatpush1.bf16.msra.mxu0 %v3300_v47  ;;  %1432 = vmatpush1.bf16.msra.mxu1 %v3301_v48  ;;  %v3379_v47 = vld [vmem:[#allocation2 + $0x2ec] ss:$16 sps:$4 sm:$0xff]   ;;  %v3374_v48 = vld [vmem:[#allocation2 + $0x2e0] ss:$16 sps:$4 sm:$0xff]  }
  0x3d   :  { %1310 = vmatprep.subr.bf16.mxu0 %v3302_v50  ;;  %1433 = vmatprep.subr.bf16.mxu1 %v3304_v51  ;;  %v3382_v50 = vld [vmem:[#allocation2 + $0x304] ss:$16 sps:$4 sm:$0xff]   ;;  %v3385_v51 = vld [vmem:[#allocation2 + $0x30c] ss:$16 sps:$4 sm:$0xff]  }
  0x40   :  { %1311 = vmatpush1.bf16.msra.mxu0 %v3306_v53  ;;  %1434 = vmatpush1.bf16.msra.mxu1 %v3307_v55  ;;  %v3383_v53 = vld [vmem:[#allocation2 + $0x308] ss:$16 sps:$4 sm:$0xff]   ;;  %v3391_v55 = vld [vmem:[#allocation2 + $0x32c] ss:$16 sps:$4 sm:$0xff]  }
  0x41   :  { %1312 = vmatprep.subr.bf16.mxu0 %v3308_v56  ;;  %1435 = vmatprep.subr.bf16.mxu1 %v3310_v57  ;;  %v3386_v56 = vld [vmem:[#allocation2 + $0x320] ss:$16 sps:$4 sm:$0xff]   ;;  %v3389_v57 = vld [vmem:[#allocation2 + $0x328] ss:$16 sps:$4 sm:$0xff]  }
  0x44   :  { %1313 = vmatpush1.bf16.msra.mxu0 %v3312_v59  ;;  %1436 = vmatpush1.bf16.msra.mxu1 %v3313_v61  ;;  %v3397_v59 = vld [vmem:[#allocation2 + $0x34c] ss:$16 sps:$4 sm:$0xff]   ;;  %v3395_v61 = vld [vmem:[#allocation2 + $0x348] ss:$16 sps:$4 sm:$0xff]  }
  0x45   :  { %1314 = vmatprep.subr.bf16.mxu0 %v3314_v62  ;;  %1437 = vmatprep.subr.bf16.mxu1 %v3316_v63  ;;  %v3400_v62 = vld [vmem:[#allocation2 + $0x364] ss:$16 sps:$4 sm:$0xff]   ;;  %v3403_v63 = vld [vmem:[#allocation2 + $0x36c] ss:$16 sps:$4 sm:$0xff]  }
  0x48   :  { %1315 = vmatpush1.bf16.msra.mxu0 %v3318_v0  ;;  %1438 = vmatpush1.bf16.msra.mxu1 %v3319_v1  ;;  %v3398_v0 = vld [vmem:[#allocation2 + $0x360] ss:$16 sps:$4 sm:$0xff]   ;;  %v3401_v1 = vld [vmem:[#allocation2 + $0x368] ss:$16 sps:$4 sm:$0xff]  }
  0x49   :  { %1316 = vmatprep.subr.bf16.mxu0 %v3320_v2  ;;  %1439 = vmatprep.subr.bf16.mxu1 %v3322_v3  ;;  %v3406_v2 = vld [vmem:[#allocation2 + $0x384] ss:$16 sps:$4 sm:$0xff]   ;;  %v3409_v3 = vld [vmem:[#allocation2 + $0x38c] ss:$16 sps:$4 sm:$0xff]  }
  0x4c   :  { %1317 = vmatpush1.bf16.msra.mxu0 %v3324_v4  ;;  %1440 = vmatpush1.bf16.msra.mxu1 %v3325_v5  ;;  %v3404_v4 = vld [vmem:[#allocation2 + $0x380] ss:$16 sps:$4 sm:$0xff]   ;;  %v3407_v5 = vld [vmem:[#allocation2 + $0x388] ss:$16 sps:$4 sm:$0xff]  }
  0x4d   :  { %1318 = vmatprep.subr.bf16.mxu0 %v3326_v6  ;;  %1441 = vmatprep.subr.bf16.mxu1 %v3328_v7  ;;  %v3412_v6 = vld [vmem:[#allocation2 + $0x3a4] ss:$16 sps:$4 sm:$0xff]   ;;  %v3415_v7 = vld [vmem:[#allocation2 + $0x3ac] ss:$16 sps:$4 sm:$0xff]  }
  0x50   :  { %1319 = vmatpush1.bf16.msra.mxu0 %v3330_v9  ;;  %1442 = vmatpush1.bf16.msra.mxu1 %v3331_v10  ;;  %v3413_v9 = vld [vmem:[#allocation2 + $0x3a8] ss:$16 sps:$4 sm:$0xff]   ;;  %v3418_v10 = vld [vmem:[#allocation2 + $0x3c4] ss:$16 sps:$4 sm:$0xff]  }
  0x51   :  { %1329 = vmatprep.subr.bf16.mxu0 %v3334_v12  ;;  %1452 = vmatprep.subr.bf16.mxu1 %v3337_v13  ;;  %v3416_v12 = vld [vmem:[#allocation2 + $0x3c0] ss:$16 sps:$4 sm:$0xff]   ;;  %v3419_v13 = vld [vmem:[#allocation2 + $0x3c8] ss:$16 sps:$4 sm:$0xff]  }
  0x53   :  { %1321 = vmatmul.mubr.bf16.vlgmr.msra.gmra.mrb[0].mxu0 %v3856_v16  ;;  %1444 = vmatmul.mubr.bf16.vlgmr.msra.gmra.mrb[0].mxu1 %v3856_v16 }
  0x54   :  { %1330 = vmatpush1.bf16.msra.mxu0 %v3332_v15  ;;  %1453 = vmatpush1.bf16.msra.mxu1 %v3335_v17  ;;  %v3427_v15 = vld [vmem:[#allocation2 + $0x3ec] ss:$16 sps:$4 sm:$0xff]   ;;  %v3422_v17 = vld [vmem:[#allocation2 + $0x3e0] ss:$16 sps:$4 sm:$0xff]  }
  0x55   :  { %1331 = vmatprep.subr.bf16.mxu0 %v3340_v20  ;;  %1454 = vmatprep.subr.bf16.mxu1 %v3343_v21  ;;  %v3425_v20 = vld [vmem:[#allocation2 + $0x3e8] ss:$16 sps:$4 sm:$0xff]   ;;  %v3430_v21 = vld [vmem:[#allocation2 + $0x404] ss:$16 sps:$4 sm:$0xff]  }
  0x56   :  { %1361 = vmatprep.mubr.bf16.mxu0 %v321_v22  ;;  %1484 = vmatprep.mubr.bf16.mxu1 %v321_v22  ;;  %v3433_v22 = vld [vmem:[#allocation2 + $0x40c] ss:$16 sps:$4 sm:$0xff]  }
  0x58   :  { %1332 = vmatpush1.bf16.msra.mxu0 %v3338_v23  ;;  %1455 = vmatpush1.bf16.msra.mxu1 %v3341_v24  ;;  %v3428_v23 = vld [vmem:[#allocation2 + $0x400] ss:$16 sps:$4 sm:$0xff]   ;;  %v3431_v24 = vld [vmem:[#allocation2 + $0x408] ss:$16 sps:$4 sm:$0xff]  }
  0x59   :  { %1333 = vmatprep.subr.bf16.mxu0 %v3346_v25  ;;  %1456 = vmatprep.subr.bf16.mxu1 %v3349_v26  ;;  %v320_v25 = vcombine.high %v3856_v16, %v3856_v16  ;;  %v3436_v26 = vld [vmem:[#allocation2 + $0x424] ss:$16 sps:$4 sm:$0xff]  }
  0x5a   :  { %v3448_v16 = vld [vmem:[#allocation2 + $0x464] ss:$16 sps:$4 sm:$0xff]  }
  0x5c   :  { %1334 = vmatpush1.bf16.msra.mxu0 %v3344_v27  ;;  %1457 = vmatpush1.bf16.msra.mxu1 %v3347_v28  ;;  %v3439_v27 = vld [vmem:[#allocation2 + $0x42c] ss:$16 sps:$4 sm:$0xff]   ;;  %v3434_v28 = vld [vmem:[#allocation2 + $0x420] ss:$16 sps:$4 sm:$0xff]  }
  0x5d   :  { %1335 = vmatprep.subr.bf16.mxu0 %v3352_v29  ;;  %1458 = vmatprep.subr.bf16.mxu1 %v3355_v30  ;;  %v3437_v29 = vld [vmem:[#allocation2 + $0x428] ss:$16 sps:$4 sm:$0xff]   ;;  %v3442_v30 = vld [vmem:[#allocation2 + $0x444] ss:$16 sps:$4 sm:$0xff]  }
  0x60   :  { %1336 = vmatpush1.bf16.msra.mxu0 %v3350_v31  ;;  %1459 = vmatpush1.bf16.msra.mxu1 %v3353_v32  ;;  %v3445_v31 = vld [vmem:[#allocation2 + $0x44c] ss:$16 sps:$4 sm:$0xff]   ;;  %v3440_v32 = vld [vmem:[#allocation2 + $0x440] ss:$16 sps:$4 sm:$0xff]  }
  0x61   :  { %1337 = vmatprep.subr.bf16.mxu0 %v3358_v33  ;;  %1460 = vmatprep.subr.bf16.mxu1 %v3361_v34  ;;  %v3443_v33 = vld [vmem:[#allocation2 + $0x448] ss:$16 sps:$4 sm:$0xff]   ;;  %v3451_v34 = vld [vmem:[#allocation2 + $0x46c] ss:$16 sps:$4 sm:$0xff]  }
  0x64   :  { %1338 = vmatpush1.bf16.msra.mxu0 %v3356_v35  ;;  %1461 = vmatpush1.bf16.msra.mxu1 %v3359_v36  ;;  %v3446_v35 = vld [vmem:[#allocation2 + $0x460] ss:$16 sps:$4 sm:$0xff]   ;;  %v3449_v36 = vld [vmem:[#allocation2 + $0x468] ss:$16 sps:$4 sm:$0xff]  }
  0x65   :  { %1339 = vmatprep.subr.bf16.mxu0 %v3364_v37  ;;  %1462 = vmatprep.subr.bf16.mxu1 %v3367_v38  ;;  %v3454_v37 = vld [vmem:[#allocation2 + $0x484] ss:$16 sps:$4 sm:$0xff]   ;;  %v3457_v38 = vld [vmem:[#allocation2 + $0x48c] ss:$16 sps:$4 sm:$0xff]  }
  0x68   :  { %1340 = vmatpush1.bf16.msra.mxu0 %v3362_v39  ;;  %1463 = vmatpush1.bf16.msra.mxu1 %v3365_v40  ;;  %v3452_v39 = vld [vmem:[#allocation2 + $0x480] ss:$16 sps:$4 sm:$0xff]   ;;  %v3455_v40 = vld [vmem:[#allocation2 + $0x488] ss:$16 sps:$4 sm:$0xff]  }
  0x69   :  { %1341 = vmatprep.subr.bf16.mxu0 %v3370_v41  ;;  %1464 = vmatprep.subr.bf16.mxu1 %v3373_v43  ;;  %v3460_v41 = vld [vmem:[#allocation2 + $0x4a4] ss:$16 sps:$4 sm:$0xff]   ;;  %v3463_v43 = vld [vmem:[#allocation2 + $0x4ac] ss:$16 sps:$4 sm:$0xff]  }
  0x6c   :  { %1342 = vmatpush1.bf16.msra.mxu0 %v3368_v44  ;;  %1465 = vmatpush1.bf16.msra.mxu1 %v3371_v45  ;;  %v3461_v44 = vld [vmem:[#allocation2 + $0x4a8] ss:$16 sps:$4 sm:$0xff]   ;;  %v3466_v45 = vld [vmem:[#allocation2 + $0x4c4] ss:$16 sps:$4 sm:$0xff]  }
  0x6d   :  { %1343 = vmatprep.subr.bf16.mxu0 %v3376_v46  ;;  %1466 = vmatprep.subr.bf16.mxu1 %v3379_v47  ;;  %v3469_v46 = vld [vmem:[#allocation2 + $0x4cc] ss:$16 sps:$4 sm:$0xff]   ;;  %v3464_v47 = vld [vmem:[#allocation2 + $0x4c0] ss:$16 sps:$4 sm:$0xff]  }
  0x70   :  { %1344 = vmatpush1.bf16.msra.mxu0 %v3374_v48  ;;  %1467 = vmatpush1.bf16.msra.mxu1 %v3377_v49  ;;  %v3467_v48 = vld [vmem:[#allocation2 + $0x4c8] ss:$16 sps:$4 sm:$0xff]   ;;  %v3472_v49 = vld [vmem:[#allocation2 + $0x4e4] ss:$16 sps:$4 sm:$0xff]  }
  0x71   :  { %1345 = vmatprep.subr.bf16.mxu0 %v3382_v50  ;;  %1468 = vmatprep.subr.bf16.mxu1 %v3385_v51  ;;  %v3475_v50 = vld [vmem:[#allocation2 + $0x4ec] ss:$16 sps:$4 sm:$0xff]   ;;  %v3470_v51 = vld [vmem:[#allocation2 + $0x4e0] ss:$16 sps:$4 sm:$0xff]  }
  0x74   :  { %1346 = vmatpush1.bf16.msra.mxu0 %v3380_v52  ;;  %1469 = vmatpush1.bf16.msra.mxu1 %v3383_v53  ;;  %v3473_v52 = vld [vmem:[#allocation2 + $0x4e8] ss:$16 sps:$4 sm:$0xff]   ;;  %v3478_v53 = vld [vmem:[#allocation2 + $0x504] ss:$16 sps:$4 sm:$0xff]  }
  0x75   :  { %1347 = vmatprep.subr.bf16.mxu0 %v3388_v54  ;;  %1470 = vmatprep.subr.bf16.mxu1 %v3391_v55  ;;  %v3481_v54 = vld [vmem:[#allocation2 + $0x50c] ss:$16 sps:$4 sm:$0xff]   ;;  %v3476_v55 = vld [vmem:[#allocation2 + $0x500] ss:$16 sps:$4 sm:$0xff]  }
  0x78   :  { %1348 = vmatpush1.bf16.msra.mxu0 %v3386_v56  ;;  %1471 = vmatpush1.bf16.msra.mxu1 %v3389_v57  ;;  %v3479_v56 = vld [vmem:[#allocation2 + $0x508] ss:$16 sps:$4 sm:$0xff]   ;;  %v3484_v57 = vld [vmem:[#allocation2 + $0x524] ss:$16 sps:$4 sm:$0xff]  }
  0x79   :  { %1349 = vmatprep.subr.bf16.mxu0 %v3394_v58  ;;  %1472 = vmatprep.subr.bf16.mxu1 %v3397_v59  ;;  %v3487_v58 = vld [vmem:[#allocation2 + $0x52c] ss:$16 sps:$4 sm:$0xff]   ;;  %v3482_v59 = vld [vmem:[#allocation2 + $0x520] ss:$16 sps:$4 sm:$0xff]  }
  0x7c   :  { %1350 = vmatpush1.bf16.msra.mxu0 %v3392_v60  ;;  %1473 = vmatpush1.bf16.msra.mxu1 %v3395_v61  ;;  %v3485_v60 = vld [vmem:[#allocation2 + $0x528] ss:$16 sps:$4 sm:$0xff]   ;;  %v3490_v61 = vld [vmem:[#allocation2 + $0x544] ss:$16 sps:$4 sm:$0xff]  }
  0x7d   :  { %1351 = vmatprep.subr.bf16.mxu0 %v3400_v62  ;;  %1474 = vmatprep.subr.bf16.mxu1 %v3403_v63  ;;  %v3493_v62 = vld [vmem:[#allocation2 + $0x54c] ss:$16 sps:$4 sm:$0xff]   ;;  %v3488_v63 = vld [vmem:[#allocation2 + $0x540] ss:$16 sps:$4 sm:$0xff]  }
  0x80   :  { %1352 = vmatpush1.bf16.msra.mxu0 %v3398_v0  ;;  %1475 = vmatpush1.bf16.msra.mxu1 %v3401_v1  ;;  %v3491_v0 = vld [vmem:[#allocation2 + $0x548] ss:$16 sps:$4 sm:$0xff]   ;;  %v3496_v1 = vld [vmem:[#allocation2 + $0x564] ss:$16 sps:$4 sm:$0xff]  }
  0x81   :  { %1353 = vmatprep.subr.bf16.mxu0 %v3406_v2  ;;  %1476 = vmatprep.subr.bf16.mxu1 %v3409_v3  ;;  %v3499_v2 = vld [vmem:[#allocation2 + $0x56c] ss:$16 sps:$4 sm:$0xff]   ;;  %v3494_v3 = vld [vmem:[#allocation2 + $0x560] ss:$16 sps:$4 sm:$0xff]  }
  0x84   :  { %1354 = vmatpush1.bf16.msra.mxu0 %v3404_v4  ;;  %1477 = vmatpush1.bf16.msra.mxu1 %v3407_v5  ;;  %v3497_v4 = vld [vmem:[#allocation2 + $0x568] ss:$16 sps:$4 sm:$0xff]   ;;  %v3502_v5 = vld [vmem:[#allocation2 + $0x584] ss:$16 sps:$4 sm:$0xff]  }
  0x85   :  { %1355 = vmatprep.subr.bf16.mxu0 %v3412_v6  ;;  %1478 = vmatprep.subr.bf16.mxu1 %v3415_v7  ;;  %v3505_v6 = vld [vmem:[#allocation2 + $0x58c] ss:$16 sps:$4 sm:$0xff]   ;;  %v3500_v7 = vld [vmem:[#allocation2 + $0x580] ss:$16 sps:$4 sm:$0xff]  }
  0x88   :  { %1356 = vmatpush1.bf16.msra.mxu0 %v3410_v8  ;;  %1479 = vmatpush1.bf16.msra.mxu1 %v3413_v9  ;;  %v3503_v8 = vld [vmem:[#allocation2 + $0x588] ss:$16 sps:$4 sm:$0xff]   ;;  %v3508_v9 = vld [vmem:[#allocation2 + $0x5a4] ss:$16 sps:$4 sm:$0xff]  }
  0x89   :  { %1357 = vmatprep.subr.bf16.mxu0 %v3418_v10  ;;  %1480 = vmatprep.subr.bf16.mxu1 %v3421_v11  ;;  %v3511_v10 = vld [vmem:[#allocation2 + $0x5ac] ss:$16 sps:$4 sm:$0xff]   ;;  %v3506_v11 = vld [vmem:[#allocation2 + $0x5a0] ss:$16 sps:$4 sm:$0xff]  }
  0x8c   :  { %1358 = vmatpush1.bf16.msra.mxu0 %v3416_v12  ;;  %1481 = vmatpush1.bf16.msra.mxu1 %v3419_v13  ;;  %v3509_v12 = vld [vmem:[#allocation2 + $0x5a8] ss:$16 sps:$4 sm:$0xff]   ;;  %v3514_v13 = vld [vmem:[#allocation2 + $0x5c4] ss:$16 sps:$4 sm:$0xff]  }
  0x8d   :  { %1359 = vmatprep.subr.bf16.mxu0 %v3424_v14  ;;  %1482 = vmatprep.subr.bf16.mxu1 %v3427_v15  ;;  %v3517_v14 = vld [vmem:[#allocation2 + $0x5cc] ss:$16 sps:$4 sm:$0xff]   ;;  %v3512_v15 = vld [vmem:[#allocation2 + $0x5c0] ss:$16 sps:$4 sm:$0xff]  }
  0x90   :  { %1360 = vmatpush1.bf16.msra.mxu0 %v3422_v17  ;;  %1483 = vmatpush1.bf16.msra.mxu1 %v3425_v20  ;;  %v3515_v17 = vld [vmem:[#allocation2 + $0x5c8] ss:$16 sps:$4 sm:$0xff]   ;;  %v3520_v20 = vld [vmem:[#allocation2 + $0x5e4] ss:$16 sps:$4 sm:$0xff]  }
  0x91   :  { %1370 = vmatprep.subr.bf16.mxu0 %v3430_v21  ;;  %1493 = vmatprep.subr.bf16.mxu1 %v3433_v22  ;;  %v3523_v21 = vld [vmem:[#allocation2 + $0x5ec] ss:$16 sps:$4 sm:$0xff]   ;;  %v3518_v22 = vld [vmem:[#allocation2 + $0x5e0] ss:$16 sps:$4 sm:$0xff]  }
  0x93   :  { %1362 = vmatmul.mubr.bf16.vlgmr.msra.gmra.mrb[0].mxu0 %v320_v25  ;;  %1485 = vmatmul.mubr.bf16.vlgmr.msra.gmra.mrb[0].mxu1 %v320_v25  ;;  %v264_v25 = vsub.s32 2, %v3850_v42 }
  0x94   :  { %1371 = vmatpush1.bf16.msra.mxu0 %v3428_v23  ;;  %1494 = vmatpush1.bf16.msra.mxu1 %v3431_v24  ;;  %v3521_v23 = vld [vmem:[#allocation2 + $0x5e8] ss:$16 sps:$4 sm:$0xff]   ;;  %v3871_v24 = vsub.s32 0, %v3850_v42 }
  0x95   :  { %1372 = vmatprep.subr.bf16.mxu0 %v3436_v26  ;;  %1495 = vmatprep.subr.bf16.mxu1 %v3439_v27  ;;  %v252_v26 = vld [vmem:[%s4386_s2] sm:$0xf]  ;;  %v3878_v27 = vsub.s32 1, %v3850_v42  ;;  %s3759_s2 = smov 64  }
  0x96   :  { %1402 = vmatprep.mubr.bf16.mxu0 %v3858_v18  ;;  %1525 = vmatprep.mubr.bf16.mxu1 %v3858_v18  ;;  %v3458_v18 = vld [vmem:[#allocation2 + $0x4a0] ss:$16 sps:$4 sm:$0xff]  }
  0x98   :  { %1373 = vmatpush1.bf16.msra.mxu0 %v3434_v28  ;;  %1496 = vmatpush1.bf16.msra.mxu1 %v3437_v29  ;;  %v268_v28 = vsub.s32 3, %v3850_v42  ;;  %v257_v29 = vrot.slane %v252_v26, %v3871_v24 }
  0x99   :  { %1374 = vmatprep.subr.bf16.mxu0 %v3442_v30  ;;  %1497 = vmatprep.subr.bf16.mxu1 %v3445_v31  ;;  %v265_v30 = vrot.slane %v252_v26, %v264_v25  ;;  %v261_v31 = vrot.slane %v252_v26, %v3878_v27 }
  0x9c   :  { %1375 = vmatpush1.bf16.msra.mxu0 %v3440_v32  ;;  %1498 = vmatpush1.bf16.msra.mxu1 %v3443_v33 }
  0x9d   :  { %1376 = vmatprep.subr.bf16.mxu0 %v3448_v16  ;;  %1499 = vmatprep.subr.bf16.mxu1 %v3451_v34 }
  0xa0   :  { %1377 = vmatpush1.bf16.msra.mxu0 %v3446_v35  ;;  %1500 = vmatpush1.bf16.msra.mxu1 %v3449_v36 }
  0xa1   :  { %1378 = vmatprep.subr.bf16.mxu0 %v3454_v37  ;;  %1501 = vmatprep.subr.bf16.mxu1 %v3457_v38 }
  0xa4   :  { %1379 = vmatpush1.bf16.msra.mxu0 %v3452_v39  ;;  %1502 = vmatpush1.bf16.msra.mxu1 %v3455_v40 }
  0xa5   :  { %1380 = vmatprep.subr.bf16.mxu0 %v3460_v41  ;;  %1503 = vmatprep.subr.bf16.mxu1 %v3463_v43 }
  0xa8   :  { %1381 = vmatpush1.bf16.msra.mxu0 %v3458_v18  ;;  %1504 = vmatpush1.bf16.msra.mxu1 %v3461_v44 }
  0xa9   :  { %1382 = vmatprep.subr.bf16.mxu0 %v3466_v45  ;;  %1505 = vmatprep.subr.bf16.mxu1 %v3469_v46 }
  0xac   :  { %1383 = vmatpush1.bf16.msra.mxu0 %v3464_v47  ;;  %1506 = vmatpush1.bf16.msra.mxu1 %v3467_v48 }
  0xad   :  { %1384 = vmatprep.subr.bf16.mxu0 %v3472_v49  ;;  %1507 = vmatprep.subr.bf16.mxu1 %v3475_v50 }
  0xb0   :  { %1385 = vmatpush1.bf16.msra.mxu0 %v3470_v51  ;;  %1508 = vmatpush1.bf16.msra.mxu1 %v3473_v52 }
  0xb1   :  { %1386 = vmatprep.subr.bf16.mxu0 %v3478_v53  ;;  %1509 = vmatprep.subr.bf16.mxu1 %v3481_v54  ;;  %v3525_v54 = vld [vmem:[%s4387_s3] ss:$8 sps:$4 sm:$0xff]  }
  0xb4   :  { %1387 = vmatpush1.bf16.msra.mxu0 %v3476_v55  ;;  %1510 = vmatpush1.bf16.msra.mxu1 %v3479_v56  ;;  %v3527_v55 = vld [vmem:[%s4387_s3 + $0x4] ss:$8 sps:$4 sm:$0xff]   ;;  %v3530_v56 = vld [vmem:[%s4387_s3 + $0x14] ss:$8 sps:$4 sm:$0xff]  }
  0xb5   :  { %1388 = vmatprep.subr.bf16.mxu0 %v3484_v57  ;;  %1511 = vmatprep.subr.bf16.mxu1 %v3487_v58  ;;  %v3528_v57 = vld [vmem:[%s4387_s3 + $0x10] ss:$8 sps:$4 sm:$0xff]   ;;  %v3533_v58 = vld [vmem:[%s4387_s3 + $0x24] ss:$8 sps:$4 sm:$0xff]  }
  0xb8   :  { %1389 = vmatpush1.bf16.msra.mxu0 %v3482_v59  ;;  %1512 = vmatpush1.bf16.msra.mxu1 %v3485_v60  ;;  %v3531_v59 = vld [vmem:[%s4387_s3 + $0x20] ss:$8 sps:$4 sm:$0xff]   ;;  %v3536_v60 = vld [vmem:[%s4387_s3 + $0x34] ss:$8 sps:$4 sm:$0xff]  }
  0xb9   :  { %1390 = vmatprep.subr.bf16.mxu0 %v3490_v61  ;;  %1513 = vmatprep.subr.bf16.mxu1 %v3493_v62  ;;  %v3534_v61 = vld [vmem:[%s4387_s3 + $0x30] ss:$8 sps:$4 sm:$0xff]   ;;  %v3539_v62 = vld [vmem:[%s4387_s3 + $0x44] ss:$8 sps:$4 sm:$0xff]  }
  0xbc   :  { %1391 = vmatpush1.bf16.msra.mxu0 %v3488_v63  ;;  %1514 = vmatpush1.bf16.msra.mxu1 %v3491_v0  ;;  %v3537_v63 = vld [vmem:[%s4387_s3 + $0x40] ss:$8 sps:$4 sm:$0xff]   ;;  %v3542_v0 = vld [vmem:[%s4387_s3 + $0x54] ss:$8 sps:$4 sm:$0xff]  }
  0xbd   :  { %1392 = vmatprep.subr.bf16.mxu0 %v3496_v1  ;;  %1515 = vmatprep.subr.bf16.mxu1 %v3499_v2  ;;  %v3540_v1 = vld [vmem:[%s4387_s3 + $0x50] ss:$8 sps:$4 sm:$0xff]   ;;  %v3545_v2 = vld [vmem:[%s4387_s3 + $0x64] ss:$8 sps:$4 sm:$0xff]  }
  0xc0   :  { %1393 = vmatpush1.bf16.msra.mxu0 %v3494_v3  ;;  %1516 = vmatpush1.bf16.msra.mxu1 %v3497_v4  ;;  %v3543_v3 = vld [vmem:[%s4387_s3 + $0x60] ss:$8 sps:$4 sm:$0xff]   ;;  %v3548_v4 = vld [vmem:[%s4387_s3 + $0x74] ss:$8 sps:$4 sm:$0xff]  }
  0xc1   :  { %1394 = vmatprep.subr.bf16.mxu0 %v3502_v5  ;;  %1517 = vmatprep.subr.bf16.mxu1 %v3505_v6  ;;  %v3546_v5 = vld [vmem:[%s4387_s3 + $0x70] ss:$8 sps:$4 sm:$0xff]   ;;  %v3551_v6 = vld [vmem:[%s4387_s3 + $0x84] ss:$8 sps:$4 sm:$0xff]  }
  0xc4   :  { %1395 = vmatpush1.bf16.msra.mxu0 %v3500_v7  ;;  %1518 = vmatpush1.bf16.msra.mxu1 %v3503_v8  ;;  %v3549_v7 = vld [vmem:[%s4387_s3 + $0x80] ss:$8 sps:$4 sm:$0xff]   ;;  %v3552_v8 = vld [vmem:[%s4387_s3 + $0x90] ss:$8 sps:$4 sm:$0xff]  }
  0xc5   :  { %1396 = vmatprep.subr.bf16.mxu0 %v3508_v9  ;;  %1519 = vmatprep.subr.bf16.mxu1 %v3511_v10  ;;  %v3554_v9 = vld [vmem:[%s4387_s3 + $0x94] ss:$8 sps:$4 sm:$0xff]   ;;  %v3555_v10 = vld [vmem:[%s4387_s3 + $0xa0] ss:$8 sps:$4 sm:$0xff]  }
  0xc8   :  { %1397 = vmatpush1.bf16.msra.mxu0 %v3506_v11  ;;  %1520 = vmatpush1.bf16.msra.mxu1 %v3509_v12  ;;  %v3557_v11 = vld [vmem:[%s4387_s3 + $0xa4] ss:$8 sps:$4 sm:$0xff]  }
  0xc9   :  { %1398 = vmatprep.subr.bf16.mxu0 %v3514_v13  ;;  %1521 = vmatprep.subr.bf16.mxu1 %v3517_v14 }
  0xcc   :  { %1399 = vmatpush1.bf16.msra.mxu0 %v3512_v15  ;;  %1522 = vmatpush1.bf16.msra.mxu1 %v3515_v17  ;;  %v3558_v17 = vld [vmem:[%s4387_s3 + $0xb0] ss:$8 sps:$4 sm:$0xff]  }
  0xcd   :  { %1400 = vmatprep.subr.bf16.mxu0 %v3520_v20  ;;  %1523 = vmatprep.subr.bf16.mxu1 %v3523_v21  ;;  %v3560_v20 = vld [vmem:[%s4387_s3 + $0xb4] ss:$8 sps:$4 sm:$0xff]  }
  0xd0   :  { %1401 = vmatpush1.bf16.msra.mxu0 %v3518_v22  ;;  %1524 = vmatpush1.bf16.msra.mxu1 %v3521_v23 }
  0xd1   :  { %1819 = vmatprep.subr.bf16.mxu0 %v3527_v55  ;;  %v3593_v55 = vld [vmem:[%s4389_s5 + $0xa0] ss:$8 sps:$4 sm:$0xff]  }
  0xd3   :  { %1403 = vmatmul.mubr.bf16.vlgmr.msra.gmra.mrb[0].mxu0 %v3860_v19  ;;  %1526 = vmatmul.mubr.bf16.vlgmr.msra.gmra.mrb[0].mxu1 %v3860_v19  ;;  %v269_v19 = vrot.slane %v252_v26, %v268_v28 }
  0xd4   :  { %1820 = vmatpush1.bf16.msra.mxu0 %v3525_v54  ;;  %v3595_v54 = vld [vmem:[%s4389_s5 + $0xa4] ss:$8 sps:$4 sm:$0xff]  }
  0xd5   :  { %1821 = vmatprep.subr.bf16.mxu0 %v3530_v56 }
  0xd8   :  { %1822 = vmatpush1.bf16.msra.mxu0 %v3528_v57 }
  0xd9   :  { %1823 = vmatprep.subr.bf16.mxu0 %v3533_v58 }
  0xdc   :  { %1824 = vmatpush1.bf16.msra.mxu0 %v3531_v59 }
  0xdd   :  { %1825 = vmatprep.subr.bf16.mxu0 %v3536_v60 }
  0xe0   :  { %1826 = vmatpush1.bf16.msra.mxu0 %v3534_v61 }
  0xe1   :  { %1827 = vmatprep.subr.bf16.mxu0 %v3539_v62 }
  0xe4   :  { %1828 = vmatpush1.bf16.msra.mxu0 %v3537_v63 }
  0xe5   :  { %1829 = vmatprep.subr.bf16.mxu0 %v3542_v0 }
  0xe8   :  { %1830 = vmatpush1.bf16.msra.mxu0 %v3540_v1 }
  0xe9   :  { %1831 = vmatprep.subr.bf16.mxu0 %v3545_v2 }
  0xec   :  { %1832 = vmatpush1.bf16.msra.mxu0 %v3543_v3 }
  0xed   :  { %1833 = vmatprep.subr.bf16.mxu0 %v3548_v4 }
  0xf0   :  { %1834 = vmatpush1.bf16.msra.mxu0 %v3546_v5 }
  0xf1   :  { %1835 = vmatprep.subr.bf16.mxu0 %v3551_v6 }
  0xf4   :  { %1836 = vmatpush1.bf16.msra.mxu0 %v3549_v7 }
  0xf5   :  { %1837 = vmatprep.subr.bf16.mxu0 %v3554_v9 }
  0xf8   :  { %1838 = vmatpush1.bf16.msra.mxu0 %v3552_v8 }
  0xf9   :  { %1839 = vmatprep.subr.bf16.mxu0 %v3557_v11 }
  0xfc   :  { %1840 = vmatpush1.bf16.msra.mxu0 %v3555_v10 }
  0xfd   :  { %1841 = vmatprep.subr.bf16.mxu0 %v3560_v20  ;;  %v3598_v20 = vld [vmem:[%s4389_s5 + $0xb4] ss:$8 sps:$4 sm:$0xff]  }
 0x100   :  { %1842 = vmatpush1.bf16.msra.mxu0 %v3558_v17 }
 0x1a6   :  { %v1404_v32 = vpop.f32.mrb[0].mxu0  ;;  %v1527_v33 = vpop.f32.mrb[0].mxu1 }
 0x1a7   :  { %v3198_v16 = vadd.f32 %v1404_v32, %v257_v29  ;;  %v3200_v34 = vadd.f32 %v1527_v33, %v265_v30  ;;  %v1406_v35 = vpop.f32.mrb[1].mxu0  ;;  %v1529_v36 = vpop.f32.mrb[1].mxu1  ;;  %v1671_v29 = vld [vmem:[%s4387_s3 + $0xc0] sm:$0xff] }
 0x1a8   :  { %v3199_v37 = vadd.f32 %v1406_v35, %v261_v31  ;;  %v3201_v38 = vadd.f32 %v1529_v36, %v269_v19  ;;  %v1408_v39 = vpop.f32.mrb[2].mxu0  ;;  %v1531_v40 = vpop.f32.mrb[2].mxu1  ;;  %v3073_v30 = vcombine.high %v1671_v29, %v1671_v29  ;;  %v3072_v31 = vcombine.low %v1671_v29, %v1671_v29  ;;  %v3563_v35 = vld [vmem:[%s4389_s5] ss:$8 sps:$4 sm:$0xff]   ;;  %v3565_v36 = vld [vmem:[%s4389_s5 + $0x4] ss:$8 sps:$4 sm:$0xff]  }
 0x1a9   :  { %v1534_v41 = vmax.f32 %v3198_v16, 0.0  ;;  %v1536_v43 = vmax.f32 %v3200_v34, 0.0  ;;  %v1409_v18 = vpop.f32.mrb[3].mxu0  ;;  %v1532_v42 = vpop.f32.mrb[3].mxu1  ;;  %2035 = vmatprep.subr.bf16.mxu1 %v3565_v36  ;;  %v3571_v39 = vld [vmem:[%s4389_s5 + $0x24] ss:$8 sps:$4 sm:$0xff]  }
 0x1aa   :  { %v1535_v44 = vmax.f32 %v3199_v37, 0.0  ;;  %v1537_v45 = vmax.f32 %v3201_v38, 0.0  ;;  %3074 = vmatprep.subr.msk.bf16.mxu0 %vm1812_vm3, %v3073_v30  ;;  %v1814_v32 = vsel %vm1812_vm3, %v3072_v31, 0  ;;  %v3568_v37 = vld [vmem:[%s4389_s5 + $0x14] ss:$8 sps:$4 sm:$0xff]   ;;  %2036 = vmatpush1.bf16.msra.mxu1 %v3563_v35 }
 0x1ab   :  { %v1538_v46 = vmax.f32 %v1534_v41, %v1536_v43  ;;  %1542 = vrot.lane.b32.xlu0 %v1536_v43, %s3759_s2  ;;  %1844 = vmatpush1.bf16.msra.mxu0 %v1814_v32  ;;  %v3566_v38 = vld [vmem:[%s4389_s5 + $0x10] ss:$8 sps:$4 sm:$0xff]   ;;  %v3569_v40 = vld [vmem:[%s4389_s5 + $0x20] ss:$8 sps:$4 sm:$0xff]   ;;  %v3574_v41 = vld [vmem:[%s4389_s5 + $0x34] ss:$8 sps:$4 sm:$0xff]  }
 0x1ac   :  { %v1539_v47 = vmax.f32 %v1535_v44, %v1537_v45  ;;  %2037 = vmatprep.subr.bf16.mxu1 %v3568_v37  ;;  %v3572_v43 = vld [vmem:[%s4389_s5 + $0x30] ss:$8 sps:$4 sm:$0xff]   ;;  %v3577_v18 = vld [vmem:[%s4389_s5 + $0x44] ss:$8 sps:$4 sm:$0xff]   ;;  %v3575_v42 = vld [vmem:[%s4389_s5 + $0x40] ss:$8 sps:$4 sm:$0xff]  }
 0x1ad   :  { %v3580_v44 = vld [vmem:[%s4389_s5 + $0x54] ss:$8 sps:$4 sm:$0xff]   ;;  %v3603_v29 = vld [vmem:[%s4391_s7 + $0x4] ss:$8 sps:$4 sm:$0xff]   ;;  %v3604_v31 = vld [vmem:[%s4391_s7 + $0x10] ss:$8 sps:$4 sm:$0xff]  }
 0x1ae   :  { %2038 = vmatpush1.bf16.msra.mxu1 %v3566_v38  ;;  %v3606_v30 = vld [vmem:[%s4391_s7 + $0x14] ss:$8 sps:$4 sm:$0xff]   ;;  %2253 = vmatprep.subr.bf16.mxu0 %v3603_v29  ;;  %v3607_v32 = vld [vmem:[%s4391_s7 + $0x20] ss:$8 sps:$4 sm:$0xff]   ;;  %v3616_v37 = vld [vmem:[%s4391_s7 + $0x50] ss:$8 sps:$4 sm:$0xff]  }
 0x1af   :  { %1544 = vrot.lane.b32.xlu0 %v1537_v45, %s3759_s2  ;;  %s3765_s2 = smov 8   ;;  %2039 = vmatprep.subr.bf16.mxu1 %v3571_v39  ;;  %v3578_v45 = vld [vmem:[%s4389_s5 + $0x50] ss:$8 sps:$4 sm:$0xff]   ;;  %v3613_v35 = vld [vmem:[%s4391_s7 + $0x40] ss:$8 sps:$4 sm:$0xff]  }
 0x1b0   :  { %v3618_v36 = vld [vmem:[%s4391_s7 + $0x54] ss:$8 sps:$4 sm:$0xff]   ;;  %v3621_v38 = vld [vmem:[%s4391_s7 + $0x64] ss:$8 sps:$4 sm:$0xff]   ;;  %v3619_v39 = vld [vmem:[%s4391_s7 + $0x60] ss:$8 sps:$4 sm:$0xff]  }
 0x1b2   :  { %2040 = vmatpush1.bf16.msra.mxu1 %v3569_v40  ;;  %v3624_v40 = vld [vmem:[%s4391_s7 + $0x74] ss:$8 sps:$4 sm:$0xff]  }
 0x1b3   :  { %2041 = vmatprep.subr.bf16.mxu1 %v3574_v41  ;;  %v3622_v41 = vld [vmem:[%s4391_s7 + $0x70] ss:$8 sps:$4 sm:$0xff]  }
 0x1b6   :  { %2042 = vmatpush1.bf16.msra.mxu1 %v3572_v43  ;;  %v3627_v43 = vld [vmem:[%s4391_s7 + $0x84] ss:$8 sps:$4 sm:$0xff]  }
 0x1b7   :  { %2043 = vmatprep.subr.bf16.mxu1 %v3577_v18  ;;  %v3625_v18 = vld [vmem:[%s4391_s7 + $0x80] ss:$8 sps:$4 sm:$0xff]  }
 0x1ba   :  { %2044 = vmatpush1.bf16.msra.mxu1 %v3575_v42  ;;  %v3630_v42 = vld [vmem:[%s4391_s7 + $0x94] ss:$8 sps:$4 sm:$0xff]  }
 0x1bb   :  { %2045 = vmatprep.subr.bf16.mxu1 %v3580_v44  ;;  %v3628_v44 = vld [vmem:[%s4391_s7 + $0x90] ss:$8 sps:$4 sm:$0xff]  }
 0x1be   :  { %2046 = vmatpush1.bf16.msra.mxu1 %v3578_v45  ;;  %v3633_v45 = vld [vmem:[%s4391_s7 + $0xa4] ss:$8 sps:$4 sm:$0xff]  }
 0x21d   :  { %v1543_v48 = vpop.permute.xlu0 %1542 }
 0x21e   :  { %v1550_v49 = vmax.f32 %v1538_v46, %v1543_v48 }
 0x220   :  { %v1553_v50 = vsel %vm1546_vm0, %v1538_v46, %v1550_v49  ;;  %v3583_v46 = vld [vmem:[%s4389_s5 + $0x64] ss:$8 sps:$4 sm:$0xff]   ;;  %v3584_v49 = vld [vmem:[%s4389_s5 + $0x70] ss:$8 sps:$4 sm:$0xff]  }
 0x221   :  { %v3884_v51 = vpop.permute.xlu0 %1544  ;;  %1559 = vrot.lane.b32.xlu0 %v1553_v50, %s3760_s24  ;;  %1555 = vrot.lane.b32.xlu1 %v1553_v50, %s3761_s25 }
 0x222   :  { %v1547_v52 = vsel %vm1546_vm0, %v1543_v48, %v3884_v51  ;;  %2047 = vmatprep.subr.bf16.mxu1 %v3583_v46  ;;  %v3586_v48 = vld [vmem:[%s4389_s5 + $0x74] ss:$8 sps:$4 sm:$0xff]   ;;  %v3631_v46 = vld [vmem:[%s4391_s7 + $0xa0] ss:$8 sps:$4 sm:$0xff]  }
 0x223   :  { %v3889_v53 = vmax.f32 %v1539_v47, %v1547_v52  ;;  %v3581_v47 = vld [vmem:[%s4389_s5 + $0x60] ss:$8 sps:$4 sm:$0xff]   ;;  %v3592_v52 = vld [vmem:[%s4389_s5 + $0x94] ss:$8 sps:$4 sm:$0xff]  }
 0x224   :  { %2048 = vmatpush1.bf16.msra.mxu1 %v3581_v47  ;;  %v1672_v47 = vld [vmem:[%s4388_s4] sm:$0x3] }
 0x225   :  { %1572 = vrot.lane.b32.xlu0 %v3884_v51, %s3761_s25  ;;  %1564 = vrot.lane.b32.xlu1 %v3889_v53, %s3761_s25 }
 0x226   :  { %2049 = vmatprep.subr.bf16.mxu1 %v3586_v48  ;;  %v1677_v48 = vrot.slane %v1672_v47, %v3871_v24 }
 0x228   :  { %2050 = vmatpush1.bf16.msra.mxu1 %v3584_v49  ;;  %v1681_v49 = vrot.slane %v1672_v47, %v3878_v27  ;;  %v3683_v47 = vld [vmem:[%s4393_s9 + $0xe4] ss:$8 sps:$4 sm:$0xff]  }
 0x229   :  { %1588 = vrot.lane.b32.xlu0 %v1553_v50, %s3762_s26  ;;  %1568 = vrot.lane.b32.xlu1 %v3889_v53, %s3760_s24 }
 0x22d   :  { %1608 = vrot.lane.b32.xlu0 %v3889_v53, %s3763_s16  ;;  %1576 = vrot.lane.b32.xlu1 %v3884_v51, %s3760_s24 }
 0x231   :  { %1599 = vrot.lane.b32.xlu1 %v3889_v53, %s3764_s1 }
 0x293   :  { %v1560_v12 = vpop.permute.xlu0 %1559  ;;  %v1556_v13 = vpop.permute.xlu1 %1555 }
 0x294   :  { %v1558_v14 = vmax.f32 %v1553_v50, %v1556_v13  ;;  %v3589_v50 = vld [vmem:[%s4389_s5 + $0x84] ss:$8 sps:$4 sm:$0xff]  }
 0x295   :  { %2051 = vmatprep.subr.bf16.mxu1 %v3589_v50 }
 0x296   :  { %v1562_v15 = vmax.f32 %v1558_v14, %v1560_v12 }
 0x297   :  { %v1573_v21 = vpop.permute.xlu0 %1572  ;;  %v1565_v22 = vpop.permute.xlu1 %1564 }
 0x298   :  { %v1575_v23 = vmax.f32 %v3884_v51, %v1573_v21  ;;  %v1567_v25 = vmax.f32 %v3889_v53, %v1565_v22  ;;  %v1623_v26 = vsel %vm1622_vm1, %v1558_v14, %v1562_v15  ;;  %v3590_v53 = vld [vmem:[%s4389_s5 + $0x90] ss:$8 sps:$4 sm:$0xff]   ;;  %v1888_v22 = vld [vmem:[%s4389_s5 + $0xc0] sm:$0xff] }
 0x299   :  { %v3977_v28 = vsel %vm1624_vm2, %v1623_v26, %v1560_v12  ;;  %v3596_v21 = vld [vmem:[%s4389_s5 + $0xb0] ss:$8 sps:$4 sm:$0xff]  }
 0x29a   :  { %1612 = vrot.lane.b32.xlu0 %v1575_v23, %s3763_s16  ;;  %1592 = vrot.lane.b32.xlu1 %v1567_v25, %s3762_s26 }
 0x29b   :  { %v1569_v19 = vpop.permute.xlu1 %1568  ;;  %v1589_v56 = vpop.permute.xlu0 %1588 }
 0x29c   :  { %v1571_v16 = vmax.f32 %v1567_v25, %v1569_v19  ;;  %v3609_v19 = vld [vmem:[%s4391_s7 + $0x24] ss:$8 sps:$4 sm:$0xff]  }
 0x29e   :  { %1581 = vrot.lane.b32.xlu0 %v1558_v14, %s3760_s24  ;;  %1585 = vrot.lane.b32.xlu1 %v1562_v15, %s3760_s24 }
 0x29f   :  { %v1577_v33 = vpop.permute.xlu1 %1576  ;;  %v1609_v57 = vpop.permute.xlu0 %1608 }
 0x2a0   :  { %v1579_v34 = vmax.f32 %v1575_v23, %v1577_v33  ;;  %v3101_v23 = vcombine.high %v1888_v22, %v1888_v22  ;;  %v3612_v33 = vld [vmem:[%s4391_s7 + $0x34] ss:$8 sps:$4 sm:$0xff]  }
 0x2a2   :  { %1605 = vrot.lane.b32.xlu1 %v1571_v16, %s3764_s1  ;;  %1616 = vrot.lane.b32.xlu0 %v1579_v34, %s3763_s16  ;;  %v3615_v34 = vld [vmem:[%s4391_s7 + $0x44] ss:$8 sps:$4 sm:$0xff]  }
 0x2a3   :  { %v1600_v58 = vpop.permute.xlu1 %1599 }
 0x2a6   :  { %1596 = vrot.lane.b32.xlu1 %v1571_v16, %s3762_s26  ;;  %1619 = vrot.lane.b32.xlu0 %v3884_v51, %s3765_s2  ;;  %v3587_v51 = vld [vmem:[%s4389_s5 + $0x80] ss:$8 sps:$4 sm:$0xff]   ;;  %v3610_v16 = vld [vmem:[%s4391_s7 + $0x30] ss:$8 sps:$4 sm:$0xff]  }
 0x2a7   :  { %2052 = vmatpush1.bf16.msra.mxu1 %v3587_v51 }
 0x2a8   :  { %2053 = vmatprep.subr.bf16.mxu1 %v3592_v52 }
 0x2aa   :  { %1602 = vrot.lane.b32.xlu1 %v1567_v25, %s3764_s1  ;;  %v3100_v25 = vcombine.low %v1888_v22, %v1888_v22  ;;  %v3645_v22 = vld [vmem:[%s4393_s9 + $0x20] ss:$8 sps:$4 sm:$0xff]  }
 0x2ab   :  { %2054 = vmatpush1.bf16.msra.mxu1 %v3590_v53 }
 0x2ac   :  { %2055 = vmatprep.subr.bf16.mxu1 %v3595_v54  ;;  %v2030_v26 = vsel %vm1812_vm3, %v3100_v25, 0  ;;  %v3650_v25 = vld [vmem:[%s4393_s9 + $0x34] ss:$8 sps:$4 sm:$0xff]  }
 0x2af   :  { %2056 = vmatpush1.bf16.msra.mxu1 %v3593_v55 }
 0x2b0   :  { %2057 = vmatprep.subr.bf16.mxu1 %v3598_v20 }
 0x2b3   :  { %2058 = vmatpush1.bf16.msra.mxu1 %v3596_v21 }
 0x2b4   :  { %3102 = vmatprep.subr.msk.bf16.mxu1 %vm1812_vm3, %v3101_v23 }
 0x2b7   :  { %2060 = vmatpush1.bf16.msra.mxu1 %v2030_v26 }
 0x30c   :  { %v1613_v59 = vpop.permute.xlu0 %1612  ;;  %v1593_v60 = vpop.permute.xlu1 %1592 }
 0x310   :  { %v1582_v61 = vpop.permute.xlu0 %1581  ;;  %v1586_v62 = vpop.permute.xlu1 %1585 }
 0x311   :  { %v1627_v63 = vsel %vm1626_vm4, %v3977_v28, %v1582_v61  ;;  %v3601_v28 = vld [vmem:[%s4391_s7] ss:$8 sps:$4 sm:$0xff]   ;;  %v3634_v61 = vld [vmem:[%s4391_s7 + $0xb0] ss:$8 sps:$4 sm:$0xff]  }
 0x312   :  { %v1629_v0 = vsel %vm1628_vm5, %v1627_v63, %v1586_v62  ;;  %v2106_v62 = vld [vmem:[%s4391_s7 + $0xc0] sm:$0xff] }
 0x313   :  { %v1631_v4 = vsel %vm1630_vm7, %v1629_v0, %v1589_v56  ;;  %v3129_v63 = vcombine.high %v2106_v62, %v2106_v62  ;;  %v3128_v0 = vcombine.low %v2106_v62, %v2106_v62  ;;  %v3721_v62 = vld [vmem:[%s4395_s11 + $0x54] ss:$8 sps:$4 sm:$0xff]  }
 0x314   :  { %v1617_v1 = vpop.permute.xlu0 %1616  ;;  %v1606_v2 = vpop.permute.xlu1 %1605  ;;  %v1633_v8 = vsel %vm1632_vm8, %v1631_v4, %v1593_v60  ;;  %v3636_v60 = vld [vmem:[%s4391_s7 + $0xb4] ss:$8 sps:$4 sm:$0xff]   ;;  %v3641_v4 = vld [vmem:[%s4393_s9 + $0x4] ss:$8 sps:$4 sm:$0xff]  }
 0x315   :  { %v1641_v3 = vsel %vm1640_vm6, %v1606_v2, %v1609_v57  ;;  %v1889_v2 = vld [vmem:[%s4390_s6] sm:$0x3]  ;;  %2589 = vmatprep.subr.bf16.mxu1 %v3641_v4 }
 0x316   :  { %v1642_v5 = vsel %vm1624_vm2, %v1641_v3, %v1613_v59  ;;  %v3639_v3 = vld [vmem:[%s4393_s9] ss:$8 sps:$4 sm:$0xff]  }
 0x317   :  { %v1643_v6 = vsel %vm1626_vm4, %v1642_v5, %v1617_v1  ;;  %v2248_v1 = vsel %vm1812_vm3, %v3128_v0, 0  ;;  %v1894_v5 = vrot.slane %v1889_v2, %v3871_v24  ;;  %v3724_v0 = vld [vmem:[%s4395_s11 + $0x64] ss:$8 sps:$4 sm:$0xff]  }
 0x318   :  { %v1620_v7 = vpop.permute.xlu0 %1619  ;;  %v1597_v9 = vpop.permute.xlu1 %1596 }
 0x319   :  { %v4063_v10 = vsel %vm1546_vm0, %v1643_v6, %v1620_v7  ;;  %v1635_v11 = vsel %vm1634_vm9, %v1633_v8, %v1597_v9  ;;  %v3644_v6 = vld [vmem:[%s4393_s9 + $0x14] ss:$8 sps:$4 sm:$0xff]   ;;  %v1898_v7 = vrot.slane %v1889_v2, %v3878_v27  ;;  %v3642_v8 = vld [vmem:[%s4393_s9 + $0x10] ss:$8 sps:$4 sm:$0xff]   ;;  %v2107_v2 = vld [vmem:[%s4392_s8] sm:$0x3] }
 0x31a   :  { %v1646_v12 = vpack.c.bf16 %v4063_v10, %v4063_v10  ;;  %v1637_v13 = vsel %vm1636_vm10, %v1635_v11, %v1600_v58  ;;  %v3647_v11 = vld [vmem:[%s4393_s9 + $0x24] ss:$8 sps:$4 sm:$0xff]   ;;  %v2116_v4 = vrot.slane %v2107_v2, %v3878_v27 }
 0x31c   :  { %3075 = vmatprep.mubr.msk.bf16.mxu0 %vm1630_vm7, %v1646_v12  ;;  %v1603_v14 = vpop.permute.xlu1 %1602 }
 0x31d   :  { %v4069_v15 = vsel %vm1638_vm11, %v1637_v13, %v1603_v14 }
 0x31e   :  { %v1645_v17 = vpack.c.bf16 %v4069_v15, %v4069_v15 }
 0x320   :  { %1852 = vmatmul.mubr.bf16.vlgmr.msra.gmra.mrb[4].mxu0 %v1645_v17 }
 0x321   :  { %2254 = vmatpush1.bf16.msra.mxu0 %v3601_v28 }
 0x322   :  { %2255 = vmatprep.subr.bf16.mxu0 %v3606_v30 }
 0x325   :  { %2256 = vmatpush1.bf16.msra.mxu0 %v3604_v31  ;;  %v3651_v31 = vld [vmem:[%s4393_s9 + $0x40] ss:$8 sps:$4 sm:$0xff]  }
 0x326   :  { %2257 = vmatprep.subr.bf16.mxu0 %v3609_v19  ;;  %v3656_v19 = vld [vmem:[%s4393_s9 + $0x54] ss:$8 sps:$4 sm:$0xff]  }
 0x329   :  { %2258 = vmatpush1.bf16.msra.mxu0 %v3607_v32  ;;  %v3654_v32 = vld [vmem:[%s4393_s9 + $0x50] ss:$8 sps:$4 sm:$0xff]  }
 0x32a   :  { %2259 = vmatprep.subr.bf16.mxu0 %v3612_v33  ;;  %v3659_v33 = vld [vmem:[%s4393_s9 + $0x64] ss:$8 sps:$4 sm:$0xff]  }
 0x32d   :  { %2260 = vmatpush1.bf16.msra.mxu0 %v3610_v16  ;;  %v3657_v16 = vld [vmem:[%s4393_s9 + $0x60] ss:$8 sps:$4 sm:$0xff]  }
 0x32e   :  { %2261 = vmatprep.subr.bf16.mxu0 %v3615_v34  ;;  %v3662_v34 = vld [vmem:[%s4393_s9 + $0x74] ss:$8 sps:$4 sm:$0xff]  }
 0x331   :  { %2262 = vmatpush1.bf16.msra.mxu0 %v3613_v35  ;;  %v3660_v35 = vld [vmem:[%s4393_s9 + $0x70] ss:$8 sps:$4 sm:$0xff]  }
 0x332   :  { %2263 = vmatprep.subr.bf16.mxu0 %v3618_v36  ;;  %v3665_v36 = vld [vmem:[%s4393_s9 + $0x84] ss:$8 sps:$4 sm:$0xff]  }
 0x335   :  { %2264 = vmatpush1.bf16.msra.mxu0 %v3616_v37  ;;  %v3663_v37 = vld [vmem:[%s4393_s9 + $0x80] ss:$8 sps:$4 sm:$0xff]  }
 0x336   :  { %2265 = vmatprep.subr.bf16.mxu0 %v3621_v38  ;;  %v3668_v38 = vld [vmem:[%s4393_s9 + $0x94] ss:$8 sps:$4 sm:$0xff]  }
 0x339   :  { %2266 = vmatpush1.bf16.msra.mxu0 %v3619_v39  ;;  %v3666_v39 = vld [vmem:[%s4393_s9 + $0x90] ss:$8 sps:$4 sm:$0xff]  }
 0x33a   :  { %2267 = vmatprep.subr.bf16.mxu0 %v3624_v40  ;;  %v3671_v40 = vld [vmem:[%s4393_s9 + $0xa4] ss:$8 sps:$4 sm:$0xff]  }
 0x33d   :  { %2268 = vmatpush1.bf16.msra.mxu0 %v3622_v41  ;;  %v3669_v41 = vld [vmem:[%s4393_s9 + $0xa0] ss:$8 sps:$4 sm:$0xff]  }
 0x33e   :  { %2269 = vmatprep.subr.bf16.mxu0 %v3627_v43  ;;  %v3674_v43 = vld [vmem:[%s4393_s9 + $0xb4] ss:$8 sps:$4 sm:$0xff]  }
 0x341   :  { %2270 = vmatpush1.bf16.msra.mxu0 %v3625_v18  ;;  %v3672_v18 = vld [vmem:[%s4393_s9 + $0xb0] ss:$8 sps:$4 sm:$0xff]  }
 0x342   :  { %2271 = vmatprep.subr.bf16.mxu0 %v3630_v42  ;;  %v3677_v42 = vld [vmem:[%s4393_s9 + $0xc4] ss:$8 sps:$4 sm:$0xff]  }
 0x345   :  { %2272 = vmatpush1.bf16.msra.mxu0 %v3628_v44  ;;  %v3675_v44 = vld [vmem:[%s4393_s9 + $0xc0] ss:$8 sps:$4 sm:$0xff]  }
 0x346   :  { %2273 = vmatprep.subr.bf16.mxu0 %v3633_v45  ;;  %v3680_v45 = vld [vmem:[%s4393_s9 + $0xd4] ss:$8 sps:$4 sm:$0xff]  }
 0x349   :  { %2274 = vmatpush1.bf16.msra.mxu0 %v3631_v46  ;;  %v3678_v46 = vld [vmem:[%s4393_s9 + $0xd0] ss:$8 sps:$4 sm:$0xff]  }
 0x34a   :  { %2275 = vmatprep.subr.bf16.mxu0 %v3636_v60  ;;  %v3718_v60 = vld [vmem:[%s4395_s11 + $0x44] ss:$8 sps:$4 sm:$0xff]  }
 0x34d   :  { %2276 = vmatpush1.bf16.msra.mxu0 %v3634_v61  ;;  %v3716_v61 = vld [vmem:[%s4395_s11 + $0x40] ss:$8 sps:$4 sm:$0xff]  }
 0x34e   :  { %3130 = vmatprep.subr.msk.bf16.mxu0 %vm1812_vm3, %v3129_v63  ;;  %v3719_v63 = vld [vmem:[%s4395_s11 + $0x50] ss:$8 sps:$4 sm:$0xff]  }
 0x351   :  { %2278 = vmatpush1.bf16.msra.mxu0 %v2248_v1  ;;  %v3722_v1 = vld [vmem:[%s4395_s11 + $0x60] ss:$8 sps:$4 sm:$0xff]  }
 0x3f3   :  { %v1853_v50 = vpop.f32.mrb[4].mxu0 }
 0x3f4   :  { %v1854_v51 = vadd.f32 %v1853_v50, %v1677_v48  ;;  %v1855_v52 = vpop.f32.mrb[5].mxu0  ;;  %v3681_v48 = vld [vmem:[%s4393_s9 + $0xe0] ss:$8 sps:$4 sm:$0xff]   ;;  %v3684_v50 = vld [vmem:[%s4393_s9 + $0xf0] ss:$8 sps:$4 sm:$0xff]  }
 0x3f5   :  { %v1856_v53 = vadd.f32 %v1855_v52, %v1681_v49  ;;  %v1857_v54 = vpop.f32.mrb[6].mxu0  ;;  %v3686_v49 = vld [vmem:[%s4393_s9 + $0xf4] ss:$8 sps:$4 sm:$0xff]   ;;  %v3704_v52 = vld [vmem:[%s4395_s11] ss:$8 sps:$4 sm:$0xff]  }
 0x3f6   :  { %v1860_v55 = vmax.f32 %v1854_v51, 0.0  ;;  %v1858_v56 = vpop.f32.mrb[7].mxu0  ;;  %v3689_v51 = vld [vmem:[%s4393_s9 + $0x104] ss:$8 sps:$4 sm:$0xff]   ;;  %v3709_v54 = vld [vmem:[%s4395_s11 + $0x14] ss:$8 sps:$4 sm:$0xff]  }
 0x3f7   :  { %v1861_v57 = vmax.f32 %v1856_v53, 0.0  ;;  %v3706_v53 = vld [vmem:[%s4395_s11 + $0x4] ss:$8 sps:$4 sm:$0xff]  }
 0x3f8   :  { %v1862_v59 = vpack.c.bf16 %v1860_v55, %v1860_v55  ;;  %2798 = vmatprep.subr.bf16.mxu0 %v3706_v53  ;;  %v3707_v55 = vld [vmem:[%s4395_s11 + $0x10] ss:$8 sps:$4 sm:$0xff]   ;;  %v3712_v56 = vld [vmem:[%s4395_s11 + $0x24] ss:$8 sps:$4 sm:$0xff]   ;;  %v2693_v53 = vld [vmem:[%s4396_s12] sm:$0x3] }
 0x3f9   :  { %v1863_v58 = vpack.c.bf16 %v1861_v57, %v1861_v57  ;;  %v3710_v57 = vld [vmem:[%s4395_s11 + $0x20] ss:$8 sps:$4 sm:$0xff]  }
 0x3fb   :  { %3103 = vmatprep.mubr.msk.bf16.mxu1 %vm1630_vm7, %v1863_v58  ;;  %v3715_v58 = vld [vmem:[%s4395_s11 + $0x34] ss:$8 sps:$4 sm:$0xff]  }
 0x3fc   :  { %2068 = vmatmul.mubr.bf16.vlgmr.msra.gmra.mrb[4].mxu1 %v1862_v59  ;;  %v3713_v59 = vld [vmem:[%s4395_s11 + $0x30] ss:$8 sps:$4 sm:$0xff]  }
 0x3fd   :  { %2590 = vmatpush1.bf16.msra.mxu1 %v3639_v3  ;;  %v2112_v3 = vrot.slane %v2107_v2, %v3871_v24 }
 0x3fe   :  { %2591 = vmatprep.subr.bf16.mxu1 %v3644_v6 }
 0x401   :  { %2592 = vmatpush1.bf16.msra.mxu1 %v3642_v8 }
 0x402   :  { %2593 = vmatprep.subr.bf16.mxu1 %v3647_v11 }
 0x405   :  { %2594 = vmatpush1.bf16.msra.mxu1 %v3645_v22 }
 0x406   :  { %2595 = vmatprep.subr.bf16.mxu1 %v3650_v25  ;;  %v3690_v25 = vld [vmem:[%s4393_s9 + $0x110] ss:$8 sps:$4 sm:$0xff]  }
 0x4cf   :  { %v2069_v9 = vpop.f32.mrb[4].mxu1 }
 0x4d0   :  { %v2070_v12 = vadd.f32 %v2069_v9, %v1894_v5  ;;  %v2071_v13 = vpop.f32.mrb[5].mxu1 }
 0x4d1   :  { %v2072_v14 = vadd.f32 %v2071_v13, %v1898_v7  ;;  %v2073_v17 = vpop.f32.mrb[6].mxu1 }
 0x4d2   :  { %v2074_v20 = vpop.f32.mrb[7].mxu1  ;;  %v2076_v21 = vadd.f32 %v2070_v12, %v4069_v15  ;;  %v3648_v15 = vld [vmem:[%s4393_s9 + $0x30] ss:$8 sps:$4 sm:$0xff]  }
 0x4d3   :  { %v2077_v23 = vadd.f32 %v2072_v14, %v4063_v10  ;;  %v3653_v10 = vld [vmem:[%s4393_s9 + $0x44] ss:$8 sps:$4 sm:$0xff]   ;;  %2596 = vmatpush1.bf16.msra.mxu1 %v3648_v15  ;;  %v3693_v15 = vld [vmem:[%s4393_s9 + $0x120] ss:$8 sps:$4 sm:$0xff]  }
 0x4d4   :  { %v2078_v26 = vmax.f32 %v2076_v21, 0.0  ;;  %2597 = vmatprep.subr.bf16.mxu1 %v3653_v10  ;;  %v3687_v21 = vld [vmem:[%s4393_s9 + $0x100] ss:$8 sps:$4 sm:$0xff]   ;;  %v3696_v10 = vld [vmem:[%s4393_s9 + $0x130] ss:$8 sps:$4 sm:$0xff]  }
 0x4d5   :  { %v2079_v28 = vmax.f32 %v2077_v23, 0.0  ;;  %v3692_v23 = vld [vmem:[%s4393_s9 + $0x114] ss:$8 sps:$4 sm:$0xff]  }
 0x4d6   :  { %2298 = vrot.lane.b32.xlu0 %v2078_v26, %s3757_s19  ;;  %v2080_v30 = vpack.c.bf16 %v2078_v26, %v2078_v26  ;;  %v3766_v26 = vmov 0  }
 0x4d7   :  { %2300 = vrot.lane.b32.xlu1 %v2079_v28, %s3757_s19  ;;  %v2081_v29 = vpack.c.bf16 %v2079_v28, %v2079_v28  ;;  %2598 = vmatpush1.bf16.msra.mxu1 %v3651_v31  ;;  %v3695_v28 = vld [vmem:[%s4393_s9 + $0x124] ss:$8 sps:$4 sm:$0xff]   ;;  %v2352_v31 = vld [vmem:[%s4393_s9 + $0x150] sm:$0xff] }
 0x4d8   :  { %2599 = vmatprep.subr.bf16.mxu1 %v3656_v19  ;;  %v3699_v19 = vld [vmem:[%s4393_s9 + $0x140] ss:$8 sps:$4 sm:$0xff]  }
 0x4d9   :  { %3131 = vmatprep.mubr.msk.bf16.mxu0 %vm1630_vm7, %v2081_v29  ;;  %v3698_v29 = vld [vmem:[%s4393_s9 + $0x134] ss:$8 sps:$4 sm:$0xff]  }
 0x4da   :  { %2286 = vmatmul.mubr.bf16.vlgmr.msra.gmra.mrb[8].mxu0 %v2080_v30  ;;  %v3701_v30 = vld [vmem:[%s4393_s9 + $0x144] ss:$8 sps:$4 sm:$0xff]  }
 0x4db   :  { %2600 = vmatpush1.bf16.msra.mxu1 %v3654_v32  ;;  %2799 = vmatpush1.bf16.msra.mxu0 %v3704_v52  ;;  %v3175_v32 = vcombine.high %v2352_v31, %v2352_v31 }
 0x4dc   :  { %2601 = vmatprep.subr.bf16.mxu1 %v3659_v33  ;;  %2800 = vmatprep.subr.bf16.mxu0 %v3709_v54  ;;  %v3174_v33 = vcombine.low %v2352_v31, %v2352_v31  ;;  %v2698_v54 = vrot.slane %v2693_v53, %v3871_v24 }
 0x4df   :  { %2602 = vmatpush1.bf16.msra.mxu1 %v3657_v16  ;;  %2801 = vmatpush1.bf16.msra.mxu0 %v3707_v55  ;;  %v2702_v55 = vrot.slane %v2693_v53, %v3878_v27 }
 0x4e0   :  { %2603 = vmatprep.subr.bf16.mxu1 %v3662_v34  ;;  %2802 = vmatprep.subr.bf16.mxu0 %v3712_v56  ;;  %v2584_v34 = vsel %vm1812_vm3, %v3174_v33, 0 }
 0x4e3   :  { %2604 = vmatpush1.bf16.msra.mxu1 %v3660_v35  ;;  %2803 = vmatpush1.bf16.msra.mxu0 %v3710_v57 }
 0x4e4   :  { %2605 = vmatprep.subr.bf16.mxu1 %v3665_v36  ;;  %2804 = vmatprep.subr.bf16.mxu0 %v3715_v58 }
 0x4e7   :  { %2606 = vmatpush1.bf16.msra.mxu1 %v3663_v37  ;;  %2805 = vmatpush1.bf16.msra.mxu0 %v3713_v59  ;;  %v3727_v37 = vld [vmem:[%s4395_s11 + $0x74] ss:$8 sps:$4 sm:$0xff]  }
 0x4e8   :  { %2607 = vmatprep.subr.bf16.mxu1 %v3668_v38  ;;  %2806 = vmatprep.subr.bf16.mxu0 %v3718_v60  ;;  %v3725_v38 = vld [vmem:[%s4395_s11 + $0x70] ss:$8 sps:$4 sm:$0xff]  }
 0x4eb   :  { %2608 = vmatpush1.bf16.msra.mxu1 %v3666_v39  ;;  %2807 = vmatpush1.bf16.msra.mxu0 %v3716_v61  ;;  %v3730_v39 = vld [vmem:[%s4395_s11 + $0x84] ss:$8 sps:$4 sm:$0xff]  }
 0x4ec   :  { %2609 = vmatprep.subr.bf16.mxu1 %v3671_v40  ;;  %2808 = vmatprep.subr.bf16.mxu0 %v3721_v62  ;;  %v3728_v40 = vld [vmem:[%s4395_s11 + $0x80] ss:$8 sps:$4 sm:$0xff]  }
 0x4ef   :  { %2610 = vmatpush1.bf16.msra.mxu1 %v3669_v41  ;;  %2809 = vmatpush1.bf16.msra.mxu0 %v3719_v63  ;;  %v2353_v41 = vld [vmem:[%s4394_s10] sm:$0x3] }
 0x4f0   :  { %2611 = vmatprep.subr.bf16.mxu1 %v3674_v43  ;;  %2810 = vmatprep.subr.bf16.mxu0 %v3724_v0  ;;  %v2358_v43 = vrot.slane %v2353_v41, %v3871_v24 }
 0x4f3   :  { %2612 = vmatpush1.bf16.msra.mxu1 %v3672_v18  ;;  %2811 = vmatpush1.bf16.msra.mxu0 %v3722_v1  ;;  %v2362_v18 = vrot.slane %v2353_v41, %v3878_v27 }
 0x4f4   :  { %2613 = vmatprep.subr.bf16.mxu1 %v3677_v42  ;;  %2812 = vmatprep.subr.bf16.mxu0 %v3727_v37 }
 0x4f7   :  { %2614 = vmatpush1.bf16.msra.mxu1 %v3675_v44  ;;  %2813 = vmatpush1.bf16.msra.mxu0 %v3725_v38 }
 0x4f8   :  { %2615 = vmatprep.subr.bf16.mxu1 %v3680_v45  ;;  %2814 = vmatprep.subr.bf16.mxu0 %v3730_v39 }
 0x4fb   :  { %2616 = vmatpush1.bf16.msra.mxu1 %v3678_v46  ;;  %2815 = vmatpush1.bf16.msra.mxu0 %v3728_v40 }
 0x4fc   :  { %2617 = vmatprep.subr.bf16.mxu1 %v3683_v47 }
 0x4ff   :  { %2618 = vmatpush1.bf16.msra.mxu1 %v3681_v48 }
 0x500   :  { %2619 = vmatprep.subr.bf16.mxu1 %v3686_v49 }
 0x503   :  { %2620 = vmatpush1.bf16.msra.mxu1 %v3684_v50 }
 0x504   :  { %2630 = vmatprep.subr.bf16.mxu1 %v3689_v51 }
 0x548   :  { %v2299_v14 = vpop.permute.xlu0 %2298 }
 0x549   :  { %v2301_v16 = vpop.permute.xlu1 %2300 }
 0x54a   :  { %v2303_v35 = vsel %vm2302_vm12, %v2299_v14, %v2301_v16 }
 0x54b   :  { %v2309_v36 = vpack.c.bf16 %v2303_v35, %v2303_v35 }
 0x5ad   :  { %v2287_v5 = vpop.f32.mrb[8].mxu0 }
 0x5ae   :  { %v2288_v6 = vadd.f32 %v2287_v5, %v2112_v3  ;;  %v2289_v7 = vpop.f32.mrb[9].mxu0 }
 0x5af   :  { %v2290_v8 = vadd.f32 %v2289_v7, %v2116_v4  ;;  %v2291_v9 = vpop.f32.mrb[10].mxu0 }
 0x5b0   :  { %v2292_v11 = vpop.f32.mrb[11].mxu0  ;;  %v2294_v12 = vmax.f32 %v2288_v6, 0.0 }
 0x5b1   :  { %v2295_v13 = vmax.f32 %v2290_v8, 0.0 }
 0x5b2   :  { %v2307_v22 = vpack.c.bf16 %v2294_v12, %v2294_v12 }
 0x5b3   :  { %v2306_v17 = vsel %vm2302_vm12, %v2295_v13, %v2299_v14 }
 0x5b4   :  { %v2308_v20 = vpack.c.bf16 %v2306_v17, %v2306_v17 }
 0x5b6   :  { %2621 = vmatprep.mubr.bf16.mxu1 %v2308_v20 }
 0x5b7   :  { %2622 = vmatmul.mubr.bf16.vlgmr.msra.gmra.mrb[8].mxu1 %v2307_v22 }
 0x5b8   :  { %2631 = vmatpush1.bf16.msra.mxu1 %v3687_v21  ;;  %2662 = vmatprep.mubr.bf16.mxu1 %v3766_v26 }
 0x5b9   :  { %2632 = vmatprep.subr.bf16.mxu1 %v3692_v23 }
 0x5bc   :  { %2633 = vmatpush1.bf16.msra.mxu1 %v3690_v25 }
 0x5bd   :  { %2634 = vmatprep.subr.bf16.mxu1 %v3695_v28 }
 0x5c0   :  { %2635 = vmatpush1.bf16.msra.mxu1 %v3693_v15 }
 0x5c1   :  { %2636 = vmatprep.subr.bf16.mxu1 %v3698_v29 }
 0x5c4   :  { %2637 = vmatpush1.bf16.msra.mxu1 %v3696_v10 }
 0x5c5   :  { %2638 = vmatprep.subr.bf16.mxu1 %v3701_v30 }
 0x5c8   :  { %2639 = vmatpush1.bf16.msra.mxu1 %v3699_v19 }
 0x5c9   :  { %3176 = vmatprep.subr.msk.bf16.mxu1 %vm1812_vm3, %v3175_v32 }
 0x5cc   :  { %2641 = vmatpush1.bf16.msra.mxu1 %v2584_v34 }
 0x5cf   :  { %3177 = vmatmul.mubr.msk.bf16.vlgmr.msra.gmra.mrb[8].mxu1 %vm1634_vm9, %v2309_v36 }
 0x6a2   :  { %v2664_v42 = vpop.f32.mrb[8].mxu1 }
 0x6a3   :  { %v3202_v44 = vadd.f32 %v2664_v42, %v2358_v43  ;;  %v2666_v45 = vpop.f32.mrb[9].mxu1 }
 0x6a4   :  { %v3203_v46 = vadd.f32 %v2666_v45, %v2362_v18  ;;  %v2668_v47 = vpop.f32.mrb[10].mxu1 }
 0x6a5   :  { %v2671_v48 = vmax.f32 %v3202_v44, 0.0  ;;  %v2669_v49 = vpop.f32.mrb[11].mxu1 }
 0x6a6   :  { %v2672_v50 = vmax.f32 %v3203_v46, 0.0 }
 0x6a7   :  { %v2673_v52 = vpack.c.bf16 %v2671_v48, %v2671_v48 }
 0x6a8   :  { %v2674_v51 = vpack.c.bf16 %v2672_v50, %v2672_v50 }
 0x6aa   :  { %3196 = vmatprep.mubr.msk.bf16.mxu0 %vm2302_vm12, %v2674_v51 }
 0x6ab   :  { %2831 = vmatmul.mubr.bf16.vlgmr.msra.gmra.mrb[12].mxu0 %v2673_v52 }
 0x77e   :  { %v2832_v56 = vpop.f32.mrb[12].mxu0 }
 0x77f   :  { %v2833_v57 = vadd.f32 %v2832_v56, %v2698_v54  ;;  %v2834_v58 = vpop.f32.mrb[13].mxu0 }
 0x780   :  { %v2835_v59 = vadd.f32 %v2834_v58, %v2702_v55  ;;  %v2836_v60 = vpop.f32.mrb[14].mxu0 }
 0x781   :  { %v2837_v61 = vpop.f32.mrb[15].mxu0 }
 0x782   :  { %v2841_v62 = vcombine.low %v2833_v57, %v2835_v59 }
 0x784   :  { %3197 = vst.sshfl [vmem:[%s4397_s13] sm:$0x33 pattern:$0x76325410] %v2841_v62 }
 0x785   :  { %2855 = vsyncpa [#allocation3], 1 }

</bundles_post_ra>
